<compile_context>
chip_gen: v6e
topology: v6e:2x2x1
jax: 0.10.0
libtpu: 0.0.40
codegen_flags: <defaults>
</compile_context>

<pallas_src>
import jax
import jax.numpy as jnp
from jax.experimental import pallas as pl
from jax.experimental.pallas import tpu as pltpu


def _round_up(x, m):
    return (x + m - 1) // m * m


# ----------------------------------------------------------------------------
# Pallas kernel.  Grid = (direction, time_block); one direction per grid step.
# gates_ref: (t_blk, B, 3*Hp) f32   precomputed x@W_ih (+ folded r/z biases)
# whh_ref  : (1, Hp, 3*Hp)   bf16   fused recurrent weights for this direction
# bhn_ref  : (1, 1, Hp)      f32    recurrent bias of the n gate
# out_ref  : (t_blk, B, Hp)  f32    this direction's H-padded hidden outputs
# h_ref    : (B, Hp)         f32    hidden-state carry (VMEM scratch)
# ----------------------------------------------------------------------------
def _bigru_layer_kernel(gates_ref, whh_ref, bhn_ref, out_ref, h_ref):
    t_blk, B, _ = gates_ref.shape
    Hp = h_ref.shape[-1]

    @pl.when(pl.program_id(1) == 0)
    def _():
        h_ref[...] = jnp.zeros_like(h_ref)

    whh = whh_ref[0]                                   # (Hp, 3Hp) bf16
    bhn = jnp.broadcast_to(bhn_ref[0], (B, Hp))        # broadcast hoisted out of loop
    reverse = pl.program_id(0) == 1                    # d=1 walks time backwards

    def step(tt, h):
        t = jnp.where(reverse, t_blk - 1 - tt, tt)
        g = gates_ref[t]                               # (B, 3Hp) f32
        hg = jnp.dot(h.astype(jnp.bfloat16), whh,
                     preferred_element_type=jnp.float32)
        r = jax.nn.sigmoid(g[:, :Hp] + hg[:, :Hp])
        z = jax.nn.sigmoid(g[:, Hp:2 * Hp] + hg[:, Hp:2 * Hp])
        n = jnp.tanh(g[:, 2 * Hp:] + r * (hg[:, 2 * Hp:] + bhn))
        h = (1.0 - z) * n + z * h
        out_ref[t] = h
        return h

    # Always fully unrolled: the per-step matmul->EUP chain is the critical path.
    h_ref[...] = jax.lax.fori_loop(0, t_blk, step, h_ref[...], unroll=True)


def _bigru_layer(gates, whh_st, bhn_st, *, nb, t_blk, B, Hp):
    """One bidirectional layer.  Returns (T_pad, B, 2*Hp): fwd | bwd halves."""
    T_pad = nb * t_blk
    # fwd (d=0): time block i ascending; bwd (d=1): block nb-1-i descending.
    tmap = lambda d, i: i * (1 - d) + (nb - 1 - i) * d

    # Explicit VMEM budget from the working set (generous headroom, <= v7x 64MiB).
    vmem = (2 * t_blk * B * 3 * Hp * 4        # gates blocks (double-buffered, f32)
            + 2 * t_blk * B * Hp * 4          # output blocks
            + 2 * Hp * 3 * Hp * 2             # W_hh buffers (bf16)
            + 2 * Hp * 4 + B * Hp * 4)        # bhn + hidden carry
    vmem_limit = int(min(64 * 1024 * 1024, max(32 * 1024 * 1024, 2 * vmem)))

    return pl.pallas_call(
        _bigru_layer_kernel,
        out_shape=jax.ShapeDtypeStruct((T_pad, B, 2 * Hp), jnp.float32),
        grid_spec=pltpu.PrefetchScalarGridSpec(
            num_scalar_prefetch=0,
            grid=(2, nb),
            in_specs=[
                pl.BlockSpec((t_blk, B, 3 * Hp), lambda d, i: (tmap(d, i), 0, d)),
                # TODO(synk): on v7x at large Hp, single-buffer these near-invariant
                # weights via pipeline_mode=pl.Buffered(1) to respect 64 MiB VMEM.
                pl.BlockSpec((1, Hp, 3 * Hp), lambda d, i: (d, 0, 0)),
                pl.BlockSpec((1, 1, Hp), lambda d, i: (d, 0, 0)),
            ],
            out_specs=pl.BlockSpec((t_blk, B, Hp), lambda d, i: (tmap(d, i), 0, d)),
            scratch_shapes=[pltpu.VMEM((B, Hp), jnp.float32)],
        ),
        compiler_params=pltpu.CompilerParams(
            # direction axis parallel (2 TCs on v7x); time axis is a serial carry.
            dimension_semantics=("parallel", "arbitrary"),
            vmem_limit_bytes=vmem_limit,
        ),
    )(gates, whh_st, bhn_st)


# ----------------------------------------------------------------------------
# Weight packing: scatter (D,3H)/(H,3H) weights into 128-lane-aligned blocks.
# Combined column layout: [d0_r | d0_z | d0_n | d1_r | d1_z | d1_n], Hp each.
# ----------------------------------------------------------------------------
def _pack_layer(params_f, params_b, in_map, d_in_p, H, Hp):
    def pack_dir(wih, whh, bih, bhh):
        w = jnp.zeros((d_in_p, 3 * Hp), jnp.float32)
        whh_p = jnp.zeros((Hp, 3 * Hp), jnp.float32)
        b = jnp.zeros((3 * Hp,), jnp.float32)
        # fold b_hh into r/z biases; b_hn must stay inside r*(.)
        bias = jnp.concatenate([bih[:2 * H] + bhh[:2 * H], bih[2 * H:]])
        for g in range(3):
            col = g * Hp
            for dst, src, ln in in_map:
                w = w.at[dst:dst + ln, col:col + H].set(
                    wih[src:src + ln, g * H:(g + 1) * H])
            whh_p = whh_p.at[:H, col:col + H].set(whh[:, g * H:(g + 1) * H])
            b = b.at[col:col + H].set(bias[g * H:(g + 1) * H])
        bhn_p = jnp.zeros((Hp,), jnp.float32).at[:H].set(bhh[2 * H:])
        return w, whh_p, b, bhn_p

    wf, whhf, bf, bhnf = pack_dir(*params_f)
    wb, whhb, bb, bhnb = pack_dir(*params_b)
    w_big = jnp.concatenate([wf, wb], axis=1).astype(jnp.bfloat16)   # (Din_p, 6Hp)
    b_big = jnp.concatenate([bf, bb], axis=0)                        # (6Hp,) f32
    whh_st = jnp.stack([whhf, whhb]).astype(jnp.bfloat16)            # (2, Hp, 3Hp)
    bhn_st = jnp.stack([bhnf, bhnb])[:, None, :]                     # (2, 1, Hp) f32
    return w_big, b_big, whh_st, bhn_st


def bidirectional_gru(input_feat, params, *, t_blk_cap=32):
    """input_feat: (B, T, D). Returns (B, T, 2*H) like the PyTorch module."""
    x = jnp.transpose(input_feat, (1, 0, 2)).astype(jnp.float32)     # (T, B, D)
    T, B, D = x.shape
    H = params[0][0][1].shape[0]          # whh is (H, 3H)
    Hp = _round_up(H, 128)

    nb = pl.cdiv(T, t_blk_cap)
    t_blk = pl.cdiv(T, nb)
    T_pad = nb * t_blk

    # Padded timesteps: z pre-activation = +50 -> z == 1.0 exactly -> h_new == h.
    pad_row = (jnp.zeros((6 * Hp,), jnp.float32)
               .at[Hp:2 * Hp].set(50.0)
               .at[4 * Hp:5 * Hp].set(50.0))

    cur = x
    d_in_p = D
    in_map = [(0, 0, D)]                  # (dst_row, src_row, len) of real features
    for (p_fwd, p_bwd) in params:
        w_big, b_big, whh_st, bhn_st = _pack_layer(p_fwd, p_bwd, in_map, d_in_p, H, Hp)
        # Hoisted input projection for both directions & all timesteps: one matmul.
        gates = jnp.dot(cur.reshape(-1, d_in_p).astype(jnp.bfloat16), w_big,
                        preferred_element_type=jnp.float32) + b_big
        gates = gates.reshape(-1, B, 6 * Hp)
        if T_pad > T:
            gates = jnp.concatenate(
                [gates[:T], jnp.broadcast_to(pad_row, (T_pad - T, B, 6 * Hp))], axis=0)
        cur = _bigru_layer(gates, whh_st, bhn_st, nb=nb, t_blk=t_blk, B=B, Hp=Hp)
        # Next layer consumes the padded (T_pad, B, 2*Hp) output directly (no concat):
        # real features at columns [0:H] (fwd) and [Hp:Hp+H] (bwd).
        d_in_p = 2 * Hp
        in_map = [(0, 0, H), (Hp, H, H)]

    y = jnp.concatenate([cur[:T, :, :H], cur[:T, :, Hp:Hp + H]], axis=-1)  # (T,B,2H)
    return jnp.transpose(y, (1, 0, 2))                                     # (B,T,2H)


# ----------------------------------------------------------------------------
# Parameter construction (deterministic, PyTorch-style uniform init).
# Layout per direction: W_ih (D,3H), W_hh (H,3H), b_ih (3H,), b_hh (3H,), gates r|z|n.
# ----------------------------------------------------------------------------
def init_gru_params(key, input_size, hidden_size, num_layers):
    k = 1.0 / jnp.sqrt(hidden_size)
    params = []
    d_in = input_size
    for _ in range(num_layers):
        layer = []
        for _direction in range(2):
            key, k1, k2, k3, k4 = jax.random.split(key, 5)
            wih = jax.random.uniform(k1, (d_in, 3 * hidden_size), jnp.float32, -k, k)
            whh = jax.random.uniform(k2, (hidden_size, 3 * hidden_size), jnp.float32, -k, k)
            bih = jax.random.uniform(k3, (3 * hidden_size,), jnp.float32, -k, k)
            bhh = jax.random.uniform(k4, (3 * hidden_size,), jnp.float32, -k, k)
            layer.append((wih, whh, bih, bhh))
        params.append(tuple(layer))
        d_in = 2 * hidden_size
    return params


# ----------------------------------------------------------------------------
# Pure-JAX f32 reference (lax.scan), matching PyTorch GRU semantics.
# ----------------------------------------------------------------------------
def _gru_dir_ref(x_tbd, wih, whh, bih, bhh, *, reverse):
    xs = x_tbd[::-1] if reverse else x_tbd
    B = x_tbd.shape[1]
    H = whh.shape[0]

    def step(h, x):
        gi = x @ wih + bih
        gh = h @ whh + bhh
        r = jax.nn.sigmoid(gi[:, :H] + gh[:, :H])
        z = jax.nn.sigmoid(gi[:, H:2 * H] + gh[:, H:2 * H])
        n = jnp.tanh(gi[:, 2 * H:] + r * gh[:, 2 * H:])
        h_new = (1.0 - z) * n + z * h
        return h_new, h_new

    h0 = jnp.zeros((B, H), jnp.float32)
    _, hs = jax.lax.scan(step, h0, xs)
    return hs[::-1] if reverse else hs


def bidirectional_gru_ref(input_feat, params):
    x = jnp.transpose(input_feat, (1, 0, 2)).astype(jnp.float32)
    for (fwd, bwd) in params:
        h_f = _gru_dir_ref(x, *fwd, reverse=False)
        h_b = _gru_dir_ref(x, *bwd, reverse=True)
        x = jnp.concatenate([h_f, h_b], axis=-1)
    return jnp.transpose(x, (1, 0, 2))


# ----------------------------------------------------------------------------
if __name__ == "__main__":
    B, T = 4, 8
    INPUT_SIZE, HIDDEN_SIZE, NUM_LAYERS = 32, 32, 2

    key = jax.random.PRNGKey(0)
    key_p, key_x, key_x2 = jax.random.split(key, 3)
    params = init_gru_params(key_p, INPUT_SIZE, HIDDEN_SIZE, NUM_LAYERS)
    x = jax.random.normal(key_x, (B, T, INPUT_SIZE), jnp.float32)

    fwd = jax.jit(bidirectional_gru)
    out = jax.block_until_ready(fwd(x, params))
    assert out.shape == (B, T, 2 * HIDDEN_SIZE), out.shape

    ref = jax.block_until_ready(bidirectional_gru_ref(x, params))
    err = float(jnp.max(jnp.abs(out - ref)))
    assert err < 4e-2, err   # bf16 matmul operands, f32 accumulate/elementwise

    # Second check: awkward T exercising multi-block time grid + tail padding.
    T2 = 11
    x2 = jax.random.normal(key_x2, (B, T2, INPUT_SIZE), jnp.float32)
    out2 = jax.block_until_ready(bidirectional_gru(x2, params, t_blk_cap=4))
    ref2 = bidirectional_gru_ref(x2, params)
    err2 = float(jnp.max(jnp.abs(out2 - ref2)))
    assert out2.shape == (B, T2, 2 * HIDDEN_SIZE), out2.shape
    assert err2 < 4e-2, err2

    print("KERNEL_OK")
</pallas_src>

<mosaic_0001>
module attributes {stable_mosaic.version = 11 : i64} {
  func.func @_bigru_layer_kernel(%arg0: i32, %arg1: i32, %arg2: memref<8x4x384xf32, #tpu.memory_space<vmem>>, %arg3: memref<1x128x384xbf16, #tpu.memory_space<vmem>>, %arg4: memref<1x1x128xf32, #tpu.memory_space<vmem>>, %arg5: memref<8x4x128xf32, #tpu.memory_space<vmem>>, %arg6: memref<4x128xf32, #tpu.memory_space<vmem>>) attributes {dimension_semantics = [#tpu.dimension_semantics<parallel>, #tpu.dimension_semantics<arbitrary>], iteration_bounds = array<i64: 2, 1>, scalar_prefetch = 0 : i64, scratch_operands = 1 : i64, tpu.core_type = #tpu.core_type<tc>, window_params = [{transform_indices = @transform_0, window_bounds = array<i64: 8, 4, 384>}, {transform_indices = @transform_1, window_bounds = array<i64: 1, 128, 384>}, {transform_indices = @transform_2, window_bounds = array<i64: 1, 1, 128>}, {transform_indices = @transform_3, window_bounds = array<i64: 8, 4, 128>}]} {
    %c0_i32 = arith.constant 0 : i32
    %0 = arith.cmpi eq, %arg1, %c0_i32 : i32
    %1 = arith.extui %0 : i1 to i32
    %c0_i32_0 = arith.constant 0 : i32
    %2 = arith.cmpi ne, %1, %c0_i32_0 : i32
    scf.if %2 {
      %cst_83 = arith.constant 0.000000e+00 : f32
      %316 = vector.broadcast %cst_83 : f32 to vector<4x128xf32>
      %c0_84 = arith.constant 0 : index
      %c0_85 = arith.constant 0 : index
      %317 = vector.load %arg6[%c0_84, %c0_85] : memref<4x128xf32, #tpu.memory_space<vmem>>, vector<4x128xf32>
      tpu.vector_store %arg6[%c0_84, %c0_85], %316 {strides = array<i32>} : memref<4x128xf32, #tpu.memory_space<vmem>>, vector<4x128xf32>,
    } else {
    }
    %c0 = arith.constant 0 : index
    %c0_1 = arith.constant 0 : index
    %c0_2 = arith.constant 0 : index
    %3 = vector.load %arg3[%c0, %c0_1, %c0_2] : memref<1x128x384xbf16, #tpu.memory_space<vmem>>, vector<1x128x384xbf16>
    %4 = vector.shape_cast %3 : vector<1x128x384xbf16> to vector<128x384xbf16>
    %c0_3 = arith.constant 0 : index
    %c0_4 = arith.constant 0 : index
    %c0_5 = arith.constant 0 : index
    %5 = vector.load %arg4[%c0_3, %c0_4, %c0_5] : memref<1x1x128xf32, #tpu.memory_space<vmem>>, vector<1x1x128xf32>
    %6 = vector.shape_cast %5 : vector<1x1x128xf32> to vector<1x128xf32>
    %7 = vector.shape_cast %6 : vector<1x128xf32> to vector<1x128xf32>
    %8 = vector.broadcast %7 : vector<1x128xf32> to vector<4x128xf32>
    %c1_i32 = arith.constant 1 : i32
    %9 = arith.cmpi eq, %arg0, %c1_i32 : i32
    %c0_6 = arith.constant 0 : index
    %c0_7 = arith.constant 0 : index
    %10 = vector.load %arg6[%c0_6, %c0_7] : memref<4x128xf32, #tpu.memory_space<vmem>>, vector<4x128xf32>
    %c0_i32_8 = arith.constant 0 : i32
    %c7_i32 = arith.constant 7 : i32
    %11 = arith.subi %c7_i32, %c0_i32_8 : i32
    %12 = arith.select %9, %11, %c0_i32_8 : i32
    %13 = arith.index_cast %12 : i32 to index
    %c0_9 = arith.constant 0 : index
    %c0_10 = arith.constant 0 : index
    %14 = vector.load %arg2[%13, %c0_9, %c0_10] : memref<8x4x384xf32, #tpu.memory_space<vmem>>, vector<1x4x384xf32>
    %15 = vector.shape_cast %14 : vector<1x4x384xf32> to vector<4x384xf32>
    %16 = arith.truncf %10 : vector<4x128xf32> to vector<4x128xbf16>
    %cst = arith.constant dense<0.000000e+00> : vector<4x384xf32>
    %17 = tpu.matmul %16, %4, %cst {dimension_numbers = #tpu.dot_dimension_numbers<[1], [0], [0], [1], [0, 0, 1, 1], [], []>} : vector<4x128xbf16>, vector<128x384xbf16>, vector<4x384xf32> -> vector<4x384xf32>
    %18 = vector.extract_strided_slice %15 {offsets = [0, 0], sizes = [4, 128], strides = [1, 1]} : vector<4x384xf32> to vector<4x128xf32>
    %19 = vector.extract_strided_slice %17 {offsets = [0, 0], sizes = [4, 128], strides = [1, 1]} : vector<4x384xf32> to vector<4x128xf32>
    %20 = arith.addf %18, %19 : vector<4x128xf32>
    %21 = arith.negf %20 : vector<4x128xf32>
    %22 = math.exp %21 : vector<4x128xf32>
    %cst_11 = arith.constant 1.000000e+00 : f32
    %23 = vector.broadcast %cst_11 : f32 to vector<4x128xf32>
    %24 = arith.addf %23, %22 : vector<4x128xf32>
    %25 = arith.divf %23, %24 : vector<4x128xf32>
    %26 = vector.extract_strided_slice %15 {offsets = [0, 128], sizes = [4, 128], strides = [1, 1]} : vector<4x384xf32> to vector<4x128xf32>
    %27 = vector.extract_strided_slice %17 {offsets = [0, 128], sizes = [4, 128], strides = [1, 1]} : vector<4x384xf32> to vector<4x128xf32>
    %28 = arith.addf %26, %27 : vector<4x128xf32>
    %29 = arith.negf %28 : vector<4x128xf32>
    %30 = math.exp %29 : vector<4x128xf32>
    %cst_12 = arith.constant 1.000000e+00 : f32
    %31 = vector.broadcast %cst_12 : f32 to vector<4x128xf32>
    %32 = arith.addf %31, %30 : vector<4x128xf32>
    %33 = arith.divf %31, %32 : vector<4x128xf32>
    %34 = vector.extract_strided_slice %15 {offsets = [0, 256], sizes = [4, 128], strides = [1, 1]} : vector<4x384xf32> to vector<4x128xf32>
    %35 = vector.extract_strided_slice %17 {offsets = [0, 256], sizes = [4, 128], strides = [1, 1]} : vector<4x384xf32> to vector<4x128xf32>
    %36 = arith.addf %35, %8 : vector<4x128xf32>
    %37 = arith.mulf %25, %36 : vector<4x128xf32>
    %38 = arith.addf %34, %37 : vector<4x128xf32>
    %39 = math.tanh %38 : vector<4x128xf32>
    %cst_13 = arith.constant 1.000000e+00 : f32
    %40 = vector.broadcast %cst_13 : f32 to vector<4x128xf32>
    %41 = arith.subf %40, %33 : vector<4x128xf32>
    %42 = arith.mulf %41, %39 : vector<4x128xf32>
    %43 = arith.mulf %33, %10 : vector<4x128xf32>
    %44 = arith.addf %42, %43 : vector<4x128xf32>
    %45 = arith.index_cast %12 : i32 to index
    %c0_14 = arith.constant 0 : index
    %c0_15 = arith.constant 0 : index
    %46 = vector.load %arg5[%45, %c0_14, %c0_15] : memref<8x4x128xf32, #tpu.memory_space<vmem>>, vector<1x4x128xf32>
    %47 = vector.shape_cast %46 : vector<1x4x128xf32> to vector<4x128xf32>
    %48 = vector.shape_cast %44 : vector<4x128xf32> to vector<1x4x128xf32>
    tpu.vector_store %arg5[%45, %c0_14, %c0_15], %48 {strides = array<i32>} : memref<8x4x128xf32, #tpu.memory_space<vmem>>, vector<1x4x128xf32>,
    %c1_i32_16 = arith.constant 1 : i32
    %c7_i32_17 = arith.constant 7 : i32
    %49 = arith.subi %c7_i32_17, %c1_i32_16 : i32
    %50 = arith.select %9, %49, %c1_i32_16 : i32
    %51 = arith.index_cast %50 : i32 to index
    %c0_18 = arith.constant 0 : index
    %c0_19 = arith.constant 0 : index
    %52 = vector.load %arg2[%51, %c0_18, %c0_19] : memref<8x4x384xf32, #tpu.memory_space<vmem>>, vector<1x4x384xf32>
    %53 = vector.shape_cast %52 : vector<1x4x384xf32> to vector<4x384xf32>
    %54 = arith.truncf %44 : vector<4x128xf32> to vector<4x128xbf16>
    %cst_20 = arith.constant dense<0.000000e+00> : vector<4x384xf32>
    %55 = tpu.matmul %54, %4, %cst_20 {dimension_numbers = #tpu.dot_dimension_numbers<[1], [0], [0], [1], [0, 0, 1, 1], [], []>} : vector<4x128xbf16>, vector<128x384xbf16>, vector<4x384xf32> -> vector<4x384xf32>
    %56 = vector.extract_strided_slice %53 {offsets = [0, 0], sizes = [4, 128], strides = [1, 1]} : vector<4x384xf32> to vector<4x128xf32>
    %57 = vector.extract_strided_slice %55 {offsets = [0, 0], sizes = [4, 128], strides = [1, 1]} : vector<4x384xf32> to vector<4x128xf32>
    %58 = arith.addf %56, %57 : vector<4x128xf32>
    %59 = arith.negf %58 : vector<4x128xf32>
    %60 = math.exp %59 : vector<4x128xf32>
    %cst_21 = arith.constant 1.000000e+00 : f32
    %61 = vector.broadcast %cst_21 : f32 to vector<4x128xf32>
    %62 = arith.addf %61, %60 : vector<4x128xf32>
    %63 = arith.divf %61, %62 : vector<4x128xf32>
    %64 = vector.extract_strided_slice %53 {offsets = [0, 128], sizes = [4, 128], strides = [1, 1]} : vector<4x384xf32> to vector<4x128xf32>
    %65 = vector.extract_strided_slice %55 {offsets = [0, 128], sizes = [4, 128], strides = [1, 1]} : vector<4x384xf32> to vector<4x128xf32>
    %66 = arith.addf %64, %65 : vector<4x128xf32>
    %67 = arith.negf %66 : vector<4x128xf32>
    %68 = math.exp %67 : vector<4x128xf32>
    %cst_22 = arith.constant 1.000000e+00 : f32
    %69 = vector.broadcast %cst_22 : f32 to vector<4x128xf32>
    %70 = arith.addf %69, %68 : vector<4x128xf32>
    %71 = arith.divf %69, %70 : vector<4x128xf32>
    %72 = vector.extract_strided_slice %53 {offsets = [0, 256], sizes = [4, 128], strides = [1, 1]} : vector<4x384xf32> to vector<4x128xf32>
    %73 = vector.extract_strided_slice %55 {offsets = [0, 256], sizes = [4, 128], strides = [1, 1]} : vector<4x384xf32> to vector<4x128xf32>
    %74 = arith.addf %73, %8 : vector<4x128xf32>
    %75 = arith.mulf %63, %74 : vector<4x128xf32>
    %76 = arith.addf %72, %75 : vector<4x128xf32>
    %77 = math.tanh %76 : vector<4x128xf32>
    %cst_23 = arith.constant 1.000000e+00 : f32
    %78 = vector.broadcast %cst_23 : f32 to vector<4x128xf32>
    %79 = arith.subf %78, %71 : vector<4x128xf32>
    %80 = arith.mulf %79, %77 : vector<4x128xf32>
    %81 = arith.mulf %71, %44 : vector<4x128xf32>
    %82 = arith.addf %80, %81 : vector<4x128xf32>
    %83 = arith.index_cast %50 : i32 to index
    %c0_24 = arith.constant 0 : index
    %c0_25 = arith.constant 0 : index
    %84 = vector.load %arg5[%83, %c0_24, %c0_25] : memref<8x4x128xf32, #tpu.memory_space<vmem>>, vector<1x4x128xf32>
    %85 = vector.shape_cast %84 : vector<1x4x128xf32> to vector<4x128xf32>
    %86 = vector.shape_cast %82 : vector<4x128xf32> to vector<1x4x128xf32>
    tpu.vector_store %arg5[%83, %c0_24, %c0_25], %86 {strides = array<i32>} : memref<8x4x128xf32, #tpu.memory_space<vmem>>, vector<1x4x128xf32>,
    %c2_i32 = arith.constant 2 : i32
    %c7_i32_26 = arith.constant 7 : i32
    %87 = arith.subi %c7_i32_26, %c2_i32 : i32
    %88 = arith.select %9, %87, %c2_i32 : i32
    %89 = arith.index_cast %88 : i32 to index
    %c0_27 = arith.constant 0 : index
    %c0_28 = arith.constant 0 : index
    %90 = vector.load %arg2[%89, %c0_27, %c0_28] : memref<8x4x384xf32, #tpu.memory_space<vmem>>, vector<1x4x384xf32>
    %91 = vector.shape_cast %90 : vector<1x4x384xf32> to vector<4x384xf32>
    %92 = arith.truncf %82 : vector<4x128xf32> to vector<4x128xbf16>
    %cst_29 = arith.constant dense<0.000000e+00> : vector<4x384xf32>
    %93 = tpu.matmul %92, %4, %cst_29 {dimension_numbers = #tpu.dot_dimension_numbers<[1], [0], [0], [1], [0, 0, 1, 1], [], []>} : vector<4x128xbf16>, vector<128x384xbf16>, vector<4x384xf32> -> vector<4x384xf32>
    %94 = vector.extract_strided_slice %91 {offsets = [0, 0], sizes = [4, 128], strides = [1, 1]} : vector<4x384xf32> to vector<4x128xf32>
    %95 = vector.extract_strided_slice %93 {offsets = [0, 0], sizes = [4, 128], strides = [1, 1]} : vector<4x384xf32> to vector<4x128xf32>
    %96 = arith.addf %94, %95 : vector<4x128xf32>
    %97 = arith.negf %96 : vector<4x128xf32>
    %98 = math.exp %97 : vector<4x128xf32>
    %cst_30 = arith.constant 1.000000e+00 : f32
    %99 = vector.broadcast %cst_30 : f32 to vector<4x128xf32>
    %100 = arith.addf %99, %98 : vector<4x128xf32>
    %101 = arith.divf %99, %100 : vector<4x128xf32>
    %102 = vector.extract_strided_slice %91 {offsets = [0, 128], sizes = [4, 128], strides = [1, 1]} : vector<4x384xf32> to vector<4x128xf32>
    %103 = vector.extract_strided_slice %93 {offsets = [0, 128], sizes = [4, 128], strides = [1, 1]} : vector<4x384xf32> to vector<4x128xf32>
    %104 = arith.addf %102, %103 : vector<4x128xf32>
    %105 = arith.negf %104 : vector<4x128xf32>
    %106 = math.exp %105 : vector<4x128xf32>
    %cst_31 = arith.constant 1.000000e+00 : f32
    %107 = vector.broadcast %cst_31 : f32 to vector<4x128xf32>
    %108 = arith.addf %107, %106 : vector<4x128xf32>
    %109 = arith.divf %107, %108 : vector<4x128xf32>
    %110 = vector.extract_strided_slice %91 {offsets = [0, 256], sizes = [4, 128], strides = [1, 1]} : vector<4x384xf32> to vector<4x128xf32>
    %111 = vector.extract_strided_slice %93 {offsets = [0, 256], sizes = [4, 128], strides = [1, 1]} : vector<4x384xf32> to vector<4x128xf32>
    %112 = arith.addf %111, %8 : vector<4x128xf32>
    %113 = arith.mulf %101, %112 : vector<4x128xf32>
    %114 = arith.addf %110, %113 : vector<4x128xf32>
    %115 = math.tanh %114 : vector<4x128xf32>
    %cst_32 = arith.constant 1.000000e+00 : f32
    %116 = vector.broadcast %cst_32 : f32 to vector<4x128xf32>
    %117 = arith.subf %116, %109 : vector<4x128xf32>
    %118 = arith.mulf %117, %115 : vector<4x128xf32>
    %119 = arith.mulf %109, %82 : vector<4x128xf32>
    %120 = arith.addf %118, %119 : vector<4x128xf32>
    %121 = arith.index_cast %88 : i32 to index
    %c0_33 = arith.constant 0 : index
    %c0_34 = arith.constant 0 : index
    %122 = vector.load %arg5[%121, %c0_33, %c0_34] : memref<8x4x128xf32, #tpu.memory_space<vmem>>, vector<1x4x128xf32>
    %123 = vector.shape_cast %122 : vector<1x4x128xf32> to vector<4x128xf32>
    %124 = vector.shape_cast %120 : vector<4x128xf32> to vector<1x4x128xf32>
    tpu.vector_store %arg5[%121, %c0_33, %c0_34], %124 {strides = array<i32>} : memref<8x4x128xf32, #tpu.memory_space<vmem>>, vector<1x4x128xf32>,
    %c3_i32 = arith.constant 3 : i32
    %c7_i32_35 = arith.constant 7 : i32
    %125 = arith.subi %c7_i32_35, %c3_i32 : i32
    %126 = arith.select %9, %125, %c3_i32 : i32
    %127 = arith.index_cast %126 : i32 to index
    %c0_36 = arith.constant 0 : index
    %c0_37 = arith.constant 0 : index
    %128 = vector.load %arg2[%127, %c0_36, %c0_37] : memref<8x4x384xf32, #tpu.memory_space<vmem>>, vector<1x4x384xf32>
    %129 = vector.shape_cast %128 : vector<1x4x384xf32> to vector<4x384xf32>
    %130 = arith.truncf %120 : vector<4x128xf32> to vector<4x128xbf16>
    %cst_38 = arith.constant dense<0.000000e+00> : vector<4x384xf32>
    %131 = tpu.matmul %130, %4, %cst_38 {dimension_numbers = #tpu.dot_dimension_numbers<[1], [0], [0], [1], [0, 0, 1, 1], [], []>} : vector<4x128xbf16>, vector<128x384xbf16>, vector<4x384xf32> -> vector<4x384xf32>
    %132 = vector.extract_strided_slice %129 {offsets = [0, 0], sizes = [4, 128], strides = [1, 1]} : vector<4x384xf32> to vector<4x128xf32>
    %133 = vector.extract_strided_slice %131 {offsets = [0, 0], sizes = [4, 128], strides = [1, 1]} : vector<4x384xf32> to vector<4x128xf32>
    %134 = arith.addf %132, %133 : vector<4x128xf32>
    %135 = arith.negf %134 : vector<4x128xf32>
    %136 = math.exp %135 : vector<4x128xf32>
    %cst_39 = arith.constant 1.000000e+00 : f32
    %137 = vector.broadcast %cst_39 : f32 to vector<4x128xf32>
    %138 = arith.addf %137, %136 : vector<4x128xf32>
    %139 = arith.divf %137, %138 : vector<4x128xf32>
    %140 = vector.extract_strided_slice %129 {offsets = [0, 128], sizes = [4, 128], strides = [1, 1]} : vector<4x384xf32> to vector<4x128xf32>
    %141 = vector.extract_strided_slice %131 {offsets = [0, 128], sizes = [4, 128], strides = [1, 1]} : vector<4x384xf32> to vector<4x128xf32>
    %142 = arith.addf %140, %141 : vector<4x128xf32>
    %143 = arith.negf %142 : vector<4x128xf32>
    %144 = math.exp %143 : vector<4x128xf32>
    %cst_40 = arith.constant 1.000000e+00 : f32
    %145 = vector.broadcast %cst_40 : f32 to vector<4x128xf32>
    %146 = arith.addf %145, %144 : vector<4x128xf32>
    %147 = arith.divf %145, %146 : vector<4x128xf32>
    %148 = vector.extract_strided_slice %129 {offsets = [0, 256], sizes = [4, 128], strides = [1, 1]} : vector<4x384xf32> to vector<4x128xf32>
    %149 = vector.extract_strided_slice %131 {offsets = [0, 256], sizes = [4, 128], strides = [1, 1]} : vector<4x384xf32> to vector<4x128xf32>
    %150 = arith.addf %149, %8 : vector<4x128xf32>
    %151 = arith.mulf %139, %150 : vector<4x128xf32>
    %152 = arith.addf %148, %151 : vector<4x128xf32>
    %153 = math.tanh %152 : vector<4x128xf32>
    %cst_41 = arith.constant 1.000000e+00 : f32
    %154 = vector.broadcast %cst_41 : f32 to vector<4x128xf32>
    %155 = arith.subf %154, %147 : vector<4x128xf32>
    %156 = arith.mulf %155, %153 : vector<4x128xf32>
    %157 = arith.mulf %147, %120 : vector<4x128xf32>
    %158 = arith.addf %156, %157 : vector<4x128xf32>
    %159 = arith.index_cast %126 : i32 to index
    %c0_42 = arith.constant 0 : index
    %c0_43 = arith.constant 0 : index
    %160 = vector.load %arg5[%159, %c0_42, %c0_43] : memref<8x4x128xf32, #tpu.memory_space<vmem>>, vector<1x4x128xf32>
    %161 = vector.shape_cast %160 : vector<1x4x128xf32> to vector<4x128xf32>
    %162 = vector.shape_cast %158 : vector<4x128xf32> to vector<1x4x128xf32>
    tpu.vector_store %arg5[%159, %c0_42, %c0_43], %162 {strides = array<i32>} : memref<8x4x128xf32, #tpu.memory_space<vmem>>, vector<1x4x128xf32>,
    %c4_i32 = arith.constant 4 : i32
    %c7_i32_44 = arith.constant 7 : i32
    %163 = arith.subi %c7_i32_44, %c4_i32 : i32
    %164 = arith.select %9, %163, %c4_i32 : i32
    %165 = arith.index_cast %164 : i32 to index
    %c0_45 = arith.constant 0 : index
    %c0_46 = arith.constant 0 : index
    %166 = vector.load %arg2[%165, %c0_45, %c0_46] : memref<8x4x384xf32, #tpu.memory_space<vmem>>, vector<1x4x384xf32>
    %167 = vector.shape_cast %166 : vector<1x4x384xf32> to vector<4x384xf32>
    %168 = arith.truncf %158 : vector<4x128xf32> to vector<4x128xbf16>
    %cst_47 = arith.constant dense<0.000000e+00> : vector<4x384xf32>
    %169 = tpu.matmul %168, %4, %cst_47 {dimension_numbers = #tpu.dot_dimension_numbers<[1], [0], [0], [1], [0, 0, 1, 1], [], []>} : vector<4x128xbf16>, vector<128x384xbf16>, vector<4x384xf32> -> vector<4x384xf32>
    %170 = vector.extract_strided_slice %167 {offsets = [0, 0], sizes = [4, 128], strides = [1, 1]} : vector<4x384xf32> to vector<4x128xf32>
    %171 = vector.extract_strided_slice %169 {offsets = [0, 0], sizes = [4, 128], strides = [1, 1]} : vector<4x384xf32> to vector<4x128xf32>
    %172 = arith.addf %170, %171 : vector<4x128xf32>
    %173 = arith.negf %172 : vector<4x128xf32>
    %174 = math.exp %173 : vector<4x128xf32>
    %cst_48 = arith.constant 1.000000e+00 : f32
    %175 = vector.broadcast %cst_48 : f32 to vector<4x128xf32>
    %176 = arith.addf %175, %174 : vector<4x128xf32>
    %177 = arith.divf %175, %176 : vector<4x128xf32>
    %178 = vector.extract_strided_slice %167 {offsets = [0, 128], sizes = [4, 128], strides = [1, 1]} : vector<4x384xf32> to vector<4x128xf32>
    %179 = vector.extract_strided_slice %169 {offsets = [0, 128], sizes = [4, 128], strides = [1, 1]} : vector<4x384xf32> to vector<4x128xf32>
    %180 = arith.addf %178, %179 : vector<4x128xf32>
    %181 = arith.negf %180 : vector<4x128xf32>
    %182 = math.exp %181 : vector<4x128xf32>
    %cst_49 = arith.constant 1.000000e+00 : f32
    %183 = vector.broadcast %cst_49 : f32 to vector<4x128xf32>
    %184 = arith.addf %183, %182 : vector<4x128xf32>
    %185 = arith.divf %183, %184 : vector<4x128xf32>
    %186 = vector.extract_strided_slice %167 {offsets = [0, 256], sizes = [4, 128], strides = [1, 1]} : vector<4x384xf32> to vector<4x128xf32>
    %187 = vector.extract_strided_slice %169 {offsets = [0, 256], sizes = [4, 128], strides = [1, 1]} : vector<4x384xf32> to vector<4x128xf32>
    %188 = arith.addf %187, %8 : vector<4x128xf32>
    %189 = arith.mulf %177, %188 : vector<4x128xf32>
    %190 = arith.addf %186, %189 : vector<4x128xf32>
    %191 = math.tanh %190 : vector<4x128xf32>
    %cst_50 = arith.constant 1.000000e+00 : f32
    %192 = vector.broadcast %cst_50 : f32 to vector<4x128xf32>
    %193 = arith.subf %192, %185 : vector<4x128xf32>
    %194 = arith.mulf %193, %191 : vector<4x128xf32>
    %195 = arith.mulf %185, %158 : vector<4x128xf32>
    %196 = arith.addf %194, %195 : vector<4x128xf32>
    %197 = arith.index_cast %164 : i32 to index
    %c0_51 = arith.constant 0 : index
    %c0_52 = arith.constant 0 : index
    %198 = vector.load %arg5[%197, %c0_51, %c0_52] : memref<8x4x128xf32, #tpu.memory_space<vmem>>, vector<1x4x128xf32>
    %199 = vector.shape_cast %198 : vector<1x4x128xf32> to vector<4x128xf32>
    %200 = vector.shape_cast %196 : vector<4x128xf32> to vector<1x4x128xf32>
    tpu.vector_store %arg5[%197, %c0_51, %c0_52], %200 {strides = array<i32>} : memref<8x4x128xf32, #tpu.memory_space<vmem>>, vector<1x4x128xf32>,
    %c5_i32 = arith.constant 5 : i32
    %c7_i32_53 = arith.constant 7 : i32
    %201 = arith.subi %c7_i32_53, %c5_i32 : i32
    %202 = arith.select %9, %201, %c5_i32 : i32
    %203 = arith.index_cast %202 : i32 to index
    %c0_54 = arith.constant 0 : index
    %c0_55 = arith.constant 0 : index
    %204 = vector.load %arg2[%203, %c0_54, %c0_55] : memref<8x4x384xf32, #tpu.memory_space<vmem>>, vector<1x4x384xf32>
    %205 = vector.shape_cast %204 : vector<1x4x384xf32> to vector<4x384xf32>
    %206 = arith.truncf %196 : vector<4x128xf32> to vector<4x128xbf16>
    %cst_56 = arith.constant dense<0.000000e+00> : vector<4x384xf32>
    %207 = tpu.matmul %206, %4, %cst_56 {dimension_numbers = #tpu.dot_dimension_numbers<[1], [0], [0], [1], [0, 0, 1, 1], [], []>} : vector<4x128xbf16>, vector<128x384xbf16>, vector<4x384xf32> -> vector<4x384xf32>
    %208 = vector.extract_strided_slice %205 {offsets = [0, 0], sizes = [4, 128], strides = [1, 1]} : vector<4x384xf32> to vector<4x128xf32>
    %209 = vector.extract_strided_slice %207 {offsets = [0, 0], sizes = [4, 128], strides = [1, 1]} : vector<4x384xf32> to vector<4x128xf32>
    %210 = arith.addf %208, %209 : vector<4x128xf32>
    %211 = arith.negf %210 : vector<4x128xf32>
    %212 = math.exp %211 : vector<4x128xf32>
    %cst_57 = arith.constant 1.000000e+00 : f32
    %213 = vector.broadcast %cst_57 : f32 to vector<4x128xf32>
    %214 = arith.addf %213, %212 : vector<4x128xf32>
    %215 = arith.divf %213, %214 : vector<4x128xf32>
    %216 = vector.extract_strided_slice %205 {offsets = [0, 128], sizes = [4, 128], strides = [1, 1]} : vector<4x384xf32> to vector<4x128xf32>
    %217 = vector.extract_strided_slice %207 {offsets = [0, 128], sizes = [4, 128], strides = [1, 1]} : vector<4x384xf32> to vector<4x128xf32>
    %218 = arith.addf %216, %217 : vector<4x128xf32>
    %219 = arith.negf %218 : vector<4x128xf32>
    %220 = math.exp %219 : vector<4x128xf32>
    %cst_58 = arith.constant 1.000000e+00 : f32
    %221 = vector.broadcast %cst_58 : f32 to vector<4x128xf32>
    %222 = arith.addf %221, %220 : vector<4x128xf32>
    %223 = arith.divf %221, %222 : vector<4x128xf32>
    %224 = vector.extract_strided_slice %205 {offsets = [0, 256], sizes = [4, 128], strides = [1, 1]} : vector<4x384xf32> to vector<4x128xf32>
    %225 = vector.extract_strided_slice %207 {offsets = [0, 256], sizes = [4, 128], strides = [1, 1]} : vector<4x384xf32> to vector<4x128xf32>
    %226 = arith.addf %225, %8 : vector<4x128xf32>
    %227 = arith.mulf %215, %226 : vector<4x128xf32>
    %228 = arith.addf %224, %227 : vector<4x128xf32>
    %229 = math.tanh %228 : vector<4x128xf32>
    %cst_59 = arith.constant 1.000000e+00 : f32
    %230 = vector.broadcast %cst_59 : f32 to vector<4x128xf32>
    %231 = arith.subf %230, %223 : vector<4x128xf32>
    %232 = arith.mulf %231, %229 : vector<4x128xf32>
    %233 = arith.mulf %223, %196 : vector<4x128xf32>
    %234 = arith.addf %232, %233 : vector<4x128xf32>
    %235 = arith.index_cast %202 : i32 to index
    %c0_60 = arith.constant 0 : index
    %c0_61 = arith.constant 0 : index
    %236 = vector.load %arg5[%235, %c0_60, %c0_61] : memref<8x4x128xf32, #tpu.memory_space<vmem>>, vector<1x4x128xf32>
    %237 = vector.shape_cast %236 : vector<1x4x128xf32> to vector<4x128xf32>
    %238 = vector.shape_cast %234 : vector<4x128xf32> to vector<1x4x128xf32>
    tpu.vector_store %arg5[%235, %c0_60, %c0_61], %238 {strides = array<i32>} : memref<8x4x128xf32, #tpu.memory_space<vmem>>, vector<1x4x128xf32>,
    %c6_i32 = arith.constant 6 : i32
    %c7_i32_62 = arith.constant 7 : i32
    %239 = arith.subi %c7_i32_62, %c6_i32 : i32
    %240 = arith.select %9, %239, %c6_i32 : i32
    %241 = arith.index_cast %240 : i32 to index
    %c0_63 = arith.constant 0 : index
    %c0_64 = arith.constant 0 : index
    %242 = vector.load %arg2[%241, %c0_63, %c0_64] : memref<8x4x384xf32, #tpu.memory_space<vmem>>, vector<1x4x384xf32>
    %243 = vector.shape_cast %242 : vector<1x4x384xf32> to vector<4x384xf32>
    %244 = arith.truncf %234 : vector<4x128xf32> to vector<4x128xbf16>
    %cst_65 = arith.constant dense<0.000000e+00> : vector<4x384xf32>
    %245 = tpu.matmul %244, %4, %cst_65 {dimension_numbers = #tpu.dot_dimension_numbers<[1], [0], [0], [1], [0, 0, 1, 1], [], []>} : vector<4x128xbf16>, vector<128x384xbf16>, vector<4x384xf32> -> vector<4x384xf32>
    %246 = vector.extract_strided_slice %243 {offsets = [0, 0], sizes = [4, 128], strides = [1, 1]} : vector<4x384xf32> to vector<4x128xf32>
    %247 = vector.extract_strided_slice %245 {offsets = [0, 0], sizes = [4, 128], strides = [1, 1]} : vector<4x384xf32> to vector<4x128xf32>
    %248 = arith.addf %246, %247 : vector<4x128xf32>
    %249 = arith.negf %248 : vector<4x128xf32>
    %250 = math.exp %249 : vector<4x128xf32>
    %cst_66 = arith.constant 1.000000e+00 : f32
    %251 = vector.broadcast %cst_66 : f32 to vector<4x128xf32>
    %252 = arith.addf %251, %250 : vector<4x128xf32>
    %253 = arith.divf %251, %252 : vector<4x128xf32>
    %254 = vector.extract_strided_slice %243 {offsets = [0, 128], sizes = [4, 128], strides = [1, 1]} : vector<4x384xf32> to vector<4x128xf32>
    %255 = vector.extract_strided_slice %245 {offsets = [0, 128], sizes = [4, 128], strides = [1, 1]} : vector<4x384xf32> to vector<4x128xf32>
    %256 = arith.addf %254, %255 : vector<4x128xf32>
    %257 = arith.negf %256 : vector<4x128xf32>
    %258 = math.exp %257 : vector<4x128xf32>
    %cst_67 = arith.constant 1.000000e+00 : f32
    %259 = vector.broadcast %cst_67 : f32 to vector<4x128xf32>
    %260 = arith.addf %259, %258 : vector<4x128xf32>
    %261 = arith.divf %259, %260 : vector<4x128xf32>
    %262 = vector.extract_strided_slice %243 {offsets = [0, 256], sizes = [4, 128], strides = [1, 1]} : vector<4x384xf32> to vector<4x128xf32>
    %263 = vector.extract_strided_slice %245 {offsets = [0, 256], sizes = [4, 128], strides = [1, 1]} : vector<4x384xf32> to vector<4x128xf32>
    %264 = arith.addf %263, %8 : vector<4x128xf32>
    %265 = arith.mulf %253, %264 : vector<4x128xf32>
    %266 = arith.addf %262, %265 : vector<4x128xf32>
    %267 = math.tanh %266 : vector<4x128xf32>
    %cst_68 = arith.constant 1.000000e+00 : f32
    %268 = vector.broadcast %cst_68 : f32 to vector<4x128xf32>
    %269 = arith.subf %268, %261 : vector<4x128xf32>
    %270 = arith.mulf %269, %267 : vector<4x128xf32>
    %271 = arith.mulf %261, %234 : vector<4x128xf32>
    %272 = arith.addf %270, %271 : vector<4x128xf32>
    %273 = arith.index_cast %240 : i32 to index
    %c0_69 = arith.constant 0 : index
    %c0_70 = arith.constant 0 : index
    %274 = vector.load %arg5[%273, %c0_69, %c0_70] : memref<8x4x128xf32, #tpu.memory_space<vmem>>, vector<1x4x128xf32>
    %275 = vector.shape_cast %274 : vector<1x4x128xf32> to vector<4x128xf32>
    %276 = vector.shape_cast %272 : vector<4x128xf32> to vector<1x4x128xf32>
    tpu.vector_store %arg5[%273, %c0_69, %c0_70], %276 {strides = array<i32>} : memref<8x4x128xf32, #tpu.memory_space<vmem>>, vector<1x4x128xf32>,
    %c7_i32_71 = arith.constant 7 : i32
    %c7_i32_72 = arith.constant 7 : i32
    %277 = arith.subi %c7_i32_72, %c7_i32_71 : i32
    %278 = arith.select %9, %277, %c7_i32_71 : i32
    %279 = arith.index_cast %278 : i32 to index
    %c0_73 = arith.constant 0 : index
    %c0_74 = arith.constant 0 : index
    %280 = vector.load %arg2[%279, %c0_73, %c0_74] : memref<8x4x384xf32, #tpu.memory_space<vmem>>, vector<1x4x384xf32>
    %281 = vector.shape_cast %280 : vector<1x4x384xf32> to vector<4x384xf32>
    %282 = arith.truncf %272 : vector<4x128xf32> to vector<4x128xbf16>
    %cst_75 = arith.constant dense<0.000000e+00> : vector<4x384xf32>
    %283 = tpu.matmul %282, %4, %cst_75 {dimension_numbers = #tpu.dot_dimension_numbers<[1], [0], [0], [1], [0, 0, 1, 1], [], []>} : vector<4x128xbf16>, vector<128x384xbf16>, vector<4x384xf32> -> vector<4x384xf32>
    %284 = vector.extract_strided_slice %281 {offsets = [0, 0], sizes = [4, 128], strides = [1, 1]} : vector<4x384xf32> to vector<4x128xf32>
    %285 = vector.extract_strided_slice %283 {offsets = [0, 0], sizes = [4, 128], strides = [1, 1]} : vector<4x384xf32> to vector<4x128xf32>
    %286 = arith.addf %284, %285 : vector<4x128xf32>
    %287 = arith.negf %286 : vector<4x128xf32>
    %288 = math.exp %287 : vector<4x128xf32>
    %cst_76 = arith.constant 1.000000e+00 : f32
    %289 = vector.broadcast %cst_76 : f32 to vector<4x128xf32>
    %290 = arith.addf %289, %288 : vector<4x128xf32>
    %291 = arith.divf %289, %290 : vector<4x128xf32>
    %292 = vector.extract_strided_slice %281 {offsets = [0, 128], sizes = [4, 128], strides = [1, 1]} : vector<4x384xf32> to vector<4x128xf32>
    %293 = vector.extract_strided_slice %283 {offsets = [0, 128], sizes = [4, 128], strides = [1, 1]} : vector<4x384xf32> to vector<4x128xf32>
    %294 = arith.addf %292, %293 : vector<4x128xf32>
    %295 = arith.negf %294 : vector<4x128xf32>
    %296 = math.exp %295 : vector<4x128xf32>
    %cst_77 = arith.constant 1.000000e+00 : f32
    %297 = vector.broadcast %cst_77 : f32 to vector<4x128xf32>
    %298 = arith.addf %297, %296 : vector<4x128xf32>
    %299 = arith.divf %297, %298 : vector<4x128xf32>
    %300 = vector.extract_strided_slice %281 {offsets = [0, 256], sizes = [4, 128], strides = [1, 1]} : vector<4x384xf32> to vector<4x128xf32>
    %301 = vector.extract_strided_slice %283 {offsets = [0, 256], sizes = [4, 128], strides = [1, 1]} : vector<4x384xf32> to vector<4x128xf32>
    %302 = arith.addf %301, %8 : vector<4x128xf32>
    %303 = arith.mulf %291, %302 : vector<4x128xf32>
    %304 = arith.addf %300, %303 : vector<4x128xf32>
    %305 = math.tanh %304 : vector<4x128xf32>
    %cst_78 = arith.constant 1.000000e+00 : f32
    %306 = vector.broadcast %cst_78 : f32 to vector<4x128xf32>
    %307 = arith.subf %306, %299 : vector<4x128xf32>
    %308 = arith.mulf %307, %305 : vector<4x128xf32>
    %309 = arith.mulf %299, %272 : vector<4x128xf32>
    %310 = arith.addf %308, %309 : vector<4x128xf32>
    %311 = arith.index_cast %278 : i32 to index
    %c0_79 = arith.constant 0 : index
    %c0_80 = arith.constant 0 : index
    %312 = vector.load %arg5[%311, %c0_79, %c0_80] : memref<8x4x128xf32, #tpu.memory_space<vmem>>, vector<1x4x128xf32>
    %313 = vector.shape_cast %312 : vector<1x4x128xf32> to vector<4x128xf32>
    %314 = vector.shape_cast %310 : vector<4x128xf32> to vector<1x4x128xf32>
    tpu.vector_store %arg5[%311, %c0_79, %c0_80], %314 {strides = array<i32>} : memref<8x4x128xf32, #tpu.memory_space<vmem>>, vector<1x4x128xf32>,
    %c8_i32 = arith.constant 8 : i32
    %c0_81 = arith.constant 0 : index
    %c0_82 = arith.constant 0 : index
    %315 = vector.load %arg6[%c0_81, %c0_82] : memref<4x128xf32, #tpu.memory_space<vmem>>, vector<4x128xf32>
    tpu.vector_store %arg6[%c0_81, %c0_82], %310 {strides = array<i32>} : memref<4x128xf32, #tpu.memory_space<vmem>>, vector<4x128xf32>,
    return
  }
  func.func @transform_0(%arg0: i32, %arg1: i32) -> (i32, i32, i32) {
    %c1_i32 = arith.constant 1 : i32
    %0 = arith.subi %c1_i32, %arg0 : i32
    %1 = arith.muli %arg1, %0 : i32
    %c0_i32 = arith.constant 0 : i32
    %2 = arith.subi %c0_i32, %arg1 : i32
    %3 = arith.muli %2, %arg0 : i32
    %4 = arith.addi %1, %3 : i32
    %c0_i32_0 = arith.constant 0 : i32
    %c0_i32_1 = arith.constant 0 : i32
    return %4, %c0_i32_0, %arg0 : i32, i32, i32
  }
  func.func @transform_1(%arg0: i32, %arg1: i32) -> (i32, i32, i32) {
    %c0_i32 = arith.constant 0 : i32
    %c0_i32_0 = arith.constant 0 : i32
    %c0_i32_1 = arith.constant 0 : i32
    return %arg0, %c0_i32, %c0_i32_0 : i32, i32, i32
  }
  func.func @transform_2(%arg0: i32, %arg1: i32) -> (i32, i32, i32) {
    %c0_i32 = arith.constant 0 : i32
    %c0_i32_0 = arith.constant 0 : i32
    %c0_i32_1 = arith.constant 0 : i32
    return %arg0, %c0_i32, %c0_i32_0 : i32, i32, i32
  }
  func.func @transform_3(%arg0: i32, %arg1: i32) -> (i32, i32, i32) {
    %c1_i32 = arith.constant 1 : i32
    %0 = arith.subi %c1_i32, %arg0 : i32
    %1 = arith.muli %arg1, %0 : i32
    %c0_i32 = arith.constant 0 : i32
    %2 = arith.subi %c0_i32, %arg1 : i32
    %3 = arith.muli %2, %arg0 : i32
    %4 = arith.addi %1, %3 : i32
    %c0_i32_0 = arith.constant 0 : i32
    %c0_i32_1 = arith.constant 0 : i32
    return %4, %c0_i32_0, %arg0 : i32, i32, i32
  }
}

</mosaic_0001>

<bundles_post_ra>
// kernel: bidirectional_gru.2
= control target key start
LH: loop header
LB: loop body
LE: loop exit
PB: predicated region body
PF: predicated region fallthrough
CT: control target
= control target key end

     0   :  { %s2202_s12 = smov 0   ;;  %s2204_s13 = smov 0   ;;  %s2791_s0 = inlined_call_operand.vmem [shape: f32[8,4,768], index: 0, kind: input, shape index: {}]   ;;  %s2792_s1 = inlined_call_operand.vmem [shape: bf16[2,128,384], index: 1, kind: input, shape index: {}]   ;;  %s2793_s2 = inlined_call_operand.vmem [shape: f32[2,1,128], index: 2, kind: input, shape index: {}]   ;;  %s2794_s3 = inlined_call_operand.vmem [shape: f32[8,4,256], index: 3, kind: output, shape index: {}]  }
   0x1   :  { %s2206_s14 = smov 0   ;;  %s2208_s15 = smov 0  }
   0x2   :  { %s2210_s16 = smov 0  }
   0x3 LB: > { %s25_s17 = sadd.s32 1, %s2173_s15  ;;  %s1635_s18 = sadd.s32 4294967295, %s2177_s16   ;;  %s2177_s16 = sphi %s2210_s16, %s13_s16   ;;  %s2173_s15 = sphi %s2208_s15, %s2799_s15   ;;  %s2169_s14 = sphi %s2206_s14, %s2798_s14   ;;  %s2165_s13 = sphi %s2204_s13, %s2797_s13   ;;  %s2161_s12 = sphi %s2202_s12, %s2796_s12  }
   0x4   : > { %p27_p0 = scmp.ge.s32.totalorder %s25_s17, 2  ;;  %p51_p1 = scmp.ne.s32.totalorder %s2165_s13, %s2161_s12 }
   0x5   : > { %p52_p2 = scmp.eq.s32.totalorder %s2177_s16, 0  ;;  %p145_p4 = scmp.eq.s32.totalorder %s1635_s18, 1 }
   0x6   : > { %s2801_s17 = smov (%p27_p0, %s25_s17), 0  ;;  %s44_s20 = sadd.s32 1, %s2165_s13 }
   0x7   : > { %p53_p3 = por %p52_p2, %p51_p1  ;;  %s40_s19 = ssub.s32 %s2173_s15, %s2801_s17 }
   0x8   : > { %p42_p5 = scmp.eq.s32.totalorder %s40_s19, 0  ;;  %p2237_p6 = por %p145_p4, %p51_p1 }
   0x9   : > { %p1638_p7 = scmp.ge.s32.totalorder %s2177_s16, 2 }
   0xa   : > { %s2242_s22 = scalar_select %p42_p5, %s2165_s13, %s44_s20  }
   0xb   : > { %167 = sbr.rel (%p1638_p7) target bundleno = 30 (0x1e), region = 16 }
  0x10   : > { %170 = sbr.rel (!%p53_p3) target bundleno = 30 (0x1e), region = 20  ;;  %s172_s23 = sand.u32 (%p53_p3), 1, %s2165_s13  }
  0x11   : > { %s1720_s24 = smul.u32 (%p53_p3), 12, %s2173_s15 }
  0x12   : > { %s1961_s25 = smul.u32 (%p53_p3), 96, %s172_s23 }
  0x13   : > { %s2250_s28 = scalar_lea.vmem (%p53_p3), %s2791_s0, %s1720_s24 }
  0x14   : > { %v200_v0 = vld [vmem:[%s2250_s28] sm:$0xff] (%p53_p3)  ;;  %v202_v1 = vld [vmem:[%s2250_s28 + $0x18] sm:$0xff] (%p53_p3)  ;;  %v204_v2 = vld [vmem:[%s2250_s28 + $0x30] sm:$0xff] (%p53_p3)  ;;  %s174_s29 = scalar_lea.vmem (%p53_p3), [#allocation3], %s1961_s25 }
  0x15   : > { %201 = vst [vmem:[%s174_s29] sm:$0xff] %v200_v0  ;;  %203 = vst [vmem:[%s174_s29 + $0xc] sm:$0xff] %v202_v1  ;;  %v206_v3 = vld [vmem:[%s2250_s28 + $0x48] sm:$0xff]  ;;  %v208_v4 = vld [vmem:[%s2250_s28 + $0x60] sm:$0xff] }
  0x16   : > { %205 = vst [vmem:[%s174_s29 + $0x18] sm:$0xff] %v204_v2  ;;  %v210_v5 = vld [vmem:[%s2250_s28 + $0x78] sm:$0xff]  ;;  %207 = vst [vmem:[%s174_s29 + $0x24] sm:$0xff] %v206_v3  ;;  %v212_v6 = vld [vmem:[%s2250_s28 + $0x90] sm:$0xff] }
  0x17   : > { %209 = vst [vmem:[%s174_s29 + $0x30] sm:$0xff] %v208_v4  ;;  %211 = vst [vmem:[%s174_s29 + $0x3c] sm:$0xff] %v210_v5  ;;  %v214_v7 = vld [vmem:[%s2250_s28 + $0xa8] sm:$0xff]  ;;  %v1642_v9 = vld [vmem:[%s2250_s28 + $0x20] sm:$0xf] }
  0x18   : > { %v1640_v8 = vld [vmem:[%s2250_s28 + $0x8] sm:$0xf]  ;;  %213 = vst [vmem:[%s174_s29 + $0x48] sm:$0xff] %v212_v6  ;;  %215 = vst [vmem:[%s174_s29 + $0x54] sm:$0xff] %v214_v7  ;;  %v1644_v10 = vld [vmem:[%s2250_s28 + $0x38] sm:$0xf] }
  0x19   : > { %1641 = vst [vmem:[%s174_s29 + $0x8] sm:$0xf] %v1640_v8  ;;  %v1646_v11 = vld [vmem:[%s2250_s28 + $0x50] sm:$0xf]  ;;  %1643 = vst [vmem:[%s174_s29 + $0x14] sm:$0xf] %v1642_v9 }
  0x1a   : > { %1645 = vst [vmem:[%s174_s29 + $0x20] sm:$0xf] %v1644_v10  ;;  %1647 = vst [vmem:[%s174_s29 + $0x2c] sm:$0xf] %v1646_v11  ;;  %v1648_v12 = vld [vmem:[%s2250_s28 + $0x68] sm:$0xf] }
  0x1b   : > { %v1650_v13 = vld [vmem:[%s2250_s28 + $0x80] sm:$0xf]  ;;  %v1652_v14 = vld [vmem:[%s2250_s28 + $0x98] sm:$0xf]  ;;  %1649 = vst [vmem:[%s174_s29 + $0x38] sm:$0xf] %v1648_v12 }
  0x1c   : > { %1651 = vst [vmem:[%s174_s29 + $0x44] sm:$0xf] %v1650_v13  ;;  %1653 = vst [vmem:[%s174_s29 + $0x50] sm:$0xf] %v1652_v14  ;;  %v1654_v15 = vld [vmem:[%s2250_s28 + $0xb0] sm:$0xf] }
  0x1d   : > { %1655 = vst [vmem:[%s174_s29 + $0x5c] sm:$0xf] %v1654_v15 }
  0x1e PF: > { %p1656_p8 = scmp.ge.s32.totalorder %s2177_s16, 1  ;;  %p258_p9 = scmp.lt.s32.totalorder %s2177_s16, 3 }
  0x20   : > { %p259_p10 = pnand %p1656_p8, %p258_p9 }
  0x21   : > { %p302_p11 = scmp.lt.s32.totalorder (!%p259_p10), %s2169_s14, 1  ;;  %p361_p12 = scmp.eq.s32.totalorder (!%p259_p10), %s2169_s14, 1 }
  0x22   : > { %262 = sbr.rel (%p259_p10) target bundleno = 2096 (0x830), region = 54  ;;  %s265_s8 = sand.u32 (!%p259_p10), 1, %s2161_s12  }
  0x23   : > { %s1962_s10 = smul.u32 (!%p259_p10), 96, %s265_s8  ;;  %s1657_s25 = sshll.u32 (!%p259_p10), %s265_s8, 5 }
  0x24   : > { %s2452_s27 = scalar_lea.vmem (!%p259_p10), [#allocation4], %s1657_s25 }
  0x25   : > { %s2438_s18 = scalar_lea.vmem (!%p259_p10), [#allocation3], %s1962_s10 }
  0x27   : > { %v2179_v16 = vmov 0.0   ;;  %v2180_v17 = vmov 0   ;;  %s2275_s30 = scalar_select %p302_p11, %s2169_s14, 1  ;;  %vm2181_vm0 = vmmov 0  }
  0x28   : > { %1801 = vmatprep.subr.bf16.mxu1 %v2179_v16  ;;  %321 = vst [vmem:[#allocation2] sm:$0xf] %v2179_v16  ;;  %530 = vmatprep.mubr.bf16.mxu0 %v2180_v17  ;;  %s2433_s9 = scalar_select %p361_p12, 7, 0 }
  0x29   : > { %1817 = vmatprep.mubr.msk.bf16.mxu1 %vm2181_vm0, %v2179_v16  ;;  %s1963_s4 = smul.u32 192, %s2275_s30  ;;  %s309_s24 = scalar_lea.vmem %s2793_s2, %s2275_s30 }
  0x2a   : > { %s1721_s11 = smul.u32 12, %s2433_s9  ;;  %v2445_v61 = vld [vmem:[%s309_s24] ss:$0 sm:$0xff]  ;;  %s1687_s26 = sshll.u32 %s2433_s9, 2 }
  0x2b   : > { %s2283_s7 = scalar_lea.vmem %s2792_s1, %s1963_s4  ;;  %s605_s28 = scalar_lea.vmem %s2452_s27, %s1687_s26 [#allocation4] }
  0x2c   : > { %v2286_v18 = vld [vmem:[%s2283_s7 + $0xac] ss:$12 sps:$4 sm:$0xff]   ;;  %v2289_v19 = vld [vmem:[%s2283_s7 + $0xa8] ss:$12 sps:$4 sm:$0xff]   ;;  %v2297_v21 = vld [vmem:[%s2283_s7 + $0x90] ss:$12 sps:$4 sm:$0xff]   ;;  %s366_s19 = scalar_lea.vmem %s2438_s18, %s1721_s11 [#allocation3] }
  0x2d   : > { %498 = vmatprep.subr.bf16.mxu0 %v2286_v18  ;;  %v2293_v20 = vld [vmem:[%s2283_s7 + $0x94] ss:$12 sps:$4 sm:$0xff]   ;;  %v2301_v22 = vld [vmem:[%s2283_s7 + $0x7c] ss:$12 sps:$4 sm:$0xff]   ;;  %v2305_v23 = vld [vmem:[%s2283_s7 + $0x78] ss:$12 sps:$4 sm:$0xff]  }
  0x2e   : > { %499 = vmatpush1.bf16.msra.mxu0 %v2289_v19  ;;  %v2309_v24 = vld [vmem:[%s2283_s7 + $0x64] ss:$12 sps:$4 sm:$0xff]   ;;  %v2316_v26 = vld [vmem:[%s2283_s7 + $0x60] ss:$12 sps:$4 sm:$0xff]   ;;  %v2328_v29 = vld [vmem:[%s2283_s7 + $0x48] ss:$12 sps:$4 sm:$0xff]  }
  0x2f   : > { %500 = vmatprep.subr.bf16.mxu0 %v2293_v20  ;;  %v2312_v25 = vld [vmem:[%s2283_s7 + $0xb0] ss:$12 sps:$4 sm:$0xff]   ;;  %v2320_v27 = vld [vmem:[%s2283_s7 + $0x4c] ss:$12 sps:$4 sm:$0xff]   ;;  %v2332_v30 = vld [vmem:[%s2283_s7 + $0x34] ss:$12 sps:$4 sm:$0xff]  }
  0x30   : > { %1802 = vmatpush3.bf16.msra.mxu1 %v2312_v25  ;;  %v2324_v28 = vld [vmem:[%s2283_s7 + $0x98] ss:$12 sps:$4 sm:$0xff]   ;;  %v2337_v31 = vld [vmem:[%s2283_s7 + $0x80] ss:$12 sps:$4 sm:$0xff]   ;;  %v2342_v32 = vld [vmem:[%s2283_s7 + $0x30] ss:$12 sps:$4 sm:$0xff]  }
  0x31   : > { %1803 = vmatprep.subr.bf16.mxu1 %v2179_v16  ;;  %v2346_v33 = vld [vmem:[%s2283_s7 + $0x1c] ss:$12 sps:$4 sm:$0xff]   ;;  %v2355_v35 = vld [vmem:[%s2283_s7 + $0x18] ss:$12 sps:$4 sm:$0xff]   ;;  %v2368_v38 = vld [vmem:[%s2283_s7] ss:$12 sps:$4 sm:$0xff]  }
  0x32   : > { %501 = vmatpush1.bf16.msra.mxu0 %v2297_v21  ;;  %v2350_v34 = vld [vmem:[%s2283_s7 + $0x68] ss:$12 sps:$4 sm:$0xff]   ;;  %v2359_v36 = vld [vmem:[%s2283_s7 + $0x4] ss:$12 sps:$4 sm:$0xff]   ;;  %v2370_v39 = vld [vmem:[#allocation2] sm:$0xf] }
  0x33   : > { %502 = vmatprep.subr.bf16.mxu0 %v2301_v22  ;;  %v2363_v37 = vld [vmem:[%s2283_s7 + $0x50] ss:$12 sps:$4 sm:$0xff]   ;;  %v2375_v40 = vld [vmem:[%s2283_s7 + $0x38] ss:$12 sps:$4 sm:$0xff]   ;;  %v369_v41 = vpack.c.bf16 %v2370_v39, %v2370_v39  ;;  %v2383_v42 = vld [vmem:[%s2283_s7 + $0x20] ss:$12 sps:$4 sm:$0xff]  }
  0x34   : > { %1804 = vmatpush3.bf16.msra.mxu1 %v2324_v28  ;;  %v2391_v43 = vld [vmem:[%s2283_s7 + $0x8] ss:$12 sps:$4 sm:$0xff]   ;;  %v367_v44 = vld [vmem:[%s366_s19] sm:$0xff]  ;;  %s2497_s12 = scalar_select %p361_p12, 6, 1 }
  0x35   : > { %1805 = vmatprep.subr.bf16.mxu1 %v2179_v16  ;;  %v587_v49 = vrot.slane %v367_v44, 4  ;;  %v368_v1 = vld [vmem:[%s366_s19 + $0x8] sm:$0xf]  ;;  %s2547_s6 = scalar_select %p361_p12, 5, 2 }
  0x36   : > { %503 = vmatpush1.bf16.msra.mxu0 %v2305_v23  ;;  %s1722_s29 = smul.u32 12, %s2497_s12  ;;  %s1691_s4 = sshll.u32 %s2497_s12, 2 }
  0x37   : > { %504 = vmatprep.subr.bf16.mxu0 %v2309_v24  ;;  %s721_s5 = scalar_lea.vmem %s2452_s27, %s1691_s4 [#allocation4]  ;;  %s1723_s8 = smul.u32 12, %s2547_s6 }
  0x38   : > { %1806 = vmatpush3.bf16.msra.mxu1 %v2337_v31  ;;  %s610_s30 = scalar_lea.vmem %s2438_s18, %s1722_s29 [#allocation3]  ;;  %s1695_s10 = sshll.u32 %s2547_s6, 2 }
  0x39   : > { %1807 = vmatprep.subr.bf16.mxu1 %v2179_v16  ;;  %v611_v11 = vld [vmem:[%s610_s30] sm:$0xff]  ;;  %s726_s9 = scalar_lea.vmem %s2438_s18, %s1723_s8 [#allocation3]  ;;  %s837_s11 = scalar_lea.vmem %s2452_s27, %s1695_s10 [#allocation4] }
  0x3a   : > { %505 = vmatpush1.bf16.msra.mxu0 %v2316_v26  ;;  %s2597_s19 = scalar_select %p361_p12, 4, 3 }
  0x3b   : > { %506 = vmatprep.subr.bf16.mxu0 %v2320_v27  ;;  %s2647_s26 = scalar_select %p361_p12, 3, 4 }
  0x3c   : > { %1808 = vmatpush3.bf16.msra.mxu1 %v2350_v34  ;;  %s1724_s20 = smul.u32 12, %s2597_s19  ;;  %s1699_s24 = sshll.u32 %s2597_s19, 2 }
  0x3d   : > { %1809 = vmatprep.subr.bf16.mxu1 %v2179_v16  ;;  %s953_s25 = scalar_lea.vmem %s2452_s27, %s1699_s24 [#allocation4]  ;;  %s1703_s29 = sshll.u32 %s2647_s26, 2 }
  0x3e   : > { %507 = vmatpush1.bf16.msra.mxu0 %v2328_v29  ;;  %s842_s23 = scalar_lea.vmem %s2438_s18, %s1724_s20 [#allocation3] }
  0x3f   : > { %508 = vmatprep.subr.bf16.mxu0 %v2332_v30  ;;  %s2697_s4 = scalar_select %p361_p12, 2, 5 }
  0x40   : > { %1810 = vmatpush3.bf16.msra.mxu1 %v2363_v37  ;;  %s2745_s10 = scalar_select %p361_p12, 1, 6 }
  0x41   : > { %1811 = vmatprep.subr.bf16.mxu1 %v2179_v16  ;;  %s1707_s8 = sshll.u32 %s2697_s4, 2 }
  0x42   : > { %509 = vmatpush1.bf16.msra.mxu0 %v2342_v32 }
  0x43   : > { %510 = vmatprep.subr.bf16.mxu0 %v2346_v33 }
  0x44   : > { %1812 = vmatpush3.bf16.msra.mxu1 %v2375_v40 }
  0x45   : > { %1813 = vmatprep.subr.bf16.mxu1 %v2179_v16 }
  0x46   : > { %511 = vmatpush1.bf16.msra.mxu0 %v2355_v35 }
  0x47   : > { %512 = vmatprep.subr.bf16.mxu0 %v2359_v36 }
  0x48   : > { %1814 = vmatpush3.bf16.msra.mxu1 %v2383_v42 }
  0x49   : > { %1815 = vmatprep.subr.bf16.mxu1 %v2179_v16 }
  0x4a   : > { %513 = vmatpush1.bf16.msra.mxu0 %v2368_v38 }
  0x4b   : > { %614 = vmatprep.subr.bf16.mxu0 %v2286_v18 }
  0x4c   : > { %1816 = vmatpush3.bf16.msra.mxu1 %v2391_v43 }
  0x4d   : > { %531 = vmatmul.mubr.bf16.vlgmr.msra.gmra.mxu0 %v369_v41  ;;  %1821 = vmatprep.subr.bf16.mxu1 %v2179_v16 }
  0x4e   : > { %615 = vmatpush1.bf16.msra.mxu0 %v2289_v19  ;;  %646 = vmatprep.mubr.bf16.mxu0 %v2180_v17 }
  0x4f   : > { %616 = vmatprep.subr.bf16.mxu0 %v2293_v20  ;;  %1818 = vmatmul.mubr.bf16.vlgmr.msra.gmra.mxu1 %v369_v41 }
  0x50   : > { %1822 = vmatpush3.bf16.msra.mxu1 %v2312_v25  ;;  %1837 = vmatprep.mubr.msk.bf16.mxu1 %vm2181_vm0, %v2179_v16 }
  0x51   : > { %1823 = vmatprep.subr.bf16.mxu1 %v2179_v16 }
  0x52   : > { %617 = vmatpush1.bf16.msra.mxu0 %v2297_v21 }
  0x53   : > { %618 = vmatprep.subr.bf16.mxu0 %v2301_v22 }
  0x54   : > { %1824 = vmatpush3.bf16.msra.mxu1 %v2324_v28 }
  0x55   : > { %1825 = vmatprep.subr.bf16.mxu1 %v2179_v16 }
  0x56   : > { %619 = vmatpush1.bf16.msra.mxu0 %v2305_v23 }
  0x57   : > { %620 = vmatprep.subr.bf16.mxu0 %v2309_v24 }
  0x58   : > { %1826 = vmatpush3.bf16.msra.mxu1 %v2337_v31 }
  0x59   : > { %1827 = vmatprep.subr.bf16.mxu1 %v2179_v16 }
  0x5a   : > { %621 = vmatpush1.bf16.msra.mxu0 %v2316_v26 }
  0x5b   : > { %622 = vmatprep.subr.bf16.mxu0 %v2320_v27 }
  0x5c   : > { %1828 = vmatpush3.bf16.msra.mxu1 %v2350_v34 }
  0x5d   : > { %1829 = vmatprep.subr.bf16.mxu1 %v2179_v16 }
  0x5e   : > { %623 = vmatpush1.bf16.msra.mxu0 %v2328_v29 }
  0x5f   : > { %624 = vmatprep.subr.bf16.mxu0 %v2332_v30 }
  0x60   : > { %1830 = vmatpush3.bf16.msra.mxu1 %v2363_v37 }
  0x61   : > { %1831 = vmatprep.subr.bf16.mxu1 %v2179_v16 }
  0x62   : > { %625 = vmatpush1.bf16.msra.mxu0 %v2342_v32 }
  0x63   : > { %626 = vmatprep.subr.bf16.mxu0 %v2346_v33 }
  0x64   : > { %1832 = vmatpush3.bf16.msra.mxu1 %v2375_v40 }
  0x65   : > { %1833 = vmatprep.subr.bf16.mxu1 %v2179_v16 }
  0x66   : > { %627 = vmatpush1.bf16.msra.mxu0 %v2355_v35 }
  0x67   : > { %628 = vmatprep.subr.bf16.mxu0 %v2359_v36 }
  0x68   : > { %1834 = vmatpush3.bf16.msra.mxu1 %v2383_v42 }
  0x69   : > { %1835 = vmatprep.subr.bf16.mxu1 %v2179_v16 }
  0x6a   : > { %629 = vmatpush1.bf16.msra.mxu0 %v2368_v38 }
  0x6b   : > { %730 = vmatprep.subr.bf16.mxu0 %v2286_v18 }
  0x6c   : > { %1836 = vmatpush3.bf16.msra.mxu1 %v2391_v43 }
  0x6d   : > { %1841 = vmatprep.subr.bf16.mxu1 %v2179_v16 }
 0x10d   : > { %v532_v45 = vpop.f32.mrf.mxu0 }
 0x10e   : > { %v579_v46 = vadd.f32 %v532_v45, %v367_v44  ;;  %v703_v44 = vrot.slane %v611_v11, 4 }
 0x10f   : > { %v534_v47 = vpop.f32.mrf.mxu0  ;;  %v573_v53 = vpop.f32.mrf.mxu1 }
 0x110   : > { %v1685_v48 = vmul.f32 -1.442695, %v579_v46  ;;  %v589_v52 = vadd.f32 %v587_v49, %v534_v47  ;;  %v596_v63 = vadd.f32 %v2445_v61, %v573_v53 }
 0x111   : > { %v536_v50 = vpop.f32.mrf.mxu0  ;;  %v1819_v55 = vpop.f32.mrf.mxu1 }
 0x112   : > { %2039 = vpow2.f32 %v1685_v48  ;;  %v1686_v54 = vmul.f32 -1.442695, %v589_v52 }
 0x113   : > { %v537_v51 = vpop.f32.mrf.mxu0  ;;  %v576_v56 = vpop.f32.mrf.mxu1 }
 0x114   : > { %2041 = vpow2.f32 %v1686_v54 }
 0x115   : > { %v1820_v57 = vpop.f32.mrf.mxu1 }
 0x116   : > { %v612_v57 = vld [vmem:[%s610_s30 + $0x8] sm:$0xf]  ;;  %s1069_s30 = scalar_lea.vmem %s2452_s27, %s1703_s29 [#allocation4] }
 0x11f   : > { %v2040_v58 = vpop.eup %2039 }
 0x120   : > { %v583_v59 = vadd.f32 1.0, %v2040_v58 }
 0x121   : > { %v2042_v60 = vpop.eup %2041 }
 0x122   : > { %2043 = vrcp.f32 %v583_v59  ;;  %v593_v62 = vadd.f32 1.0, %v2042_v60 }
 0x124   : > { %2045 = vrcp.f32 %v593_v62 }
 0x12f   : > { %v2044_v0 = vpop.eup %2043 }
 0x130   : > { %v597_v2 = vmul.f32 %v2044_v0, %v596_v63 }
 0x131   : > { %v2046_v4 = vpop.eup %2045 }
 0x132   : > { %v598_v3 = vadd.f32 %v597_v2, %v368_v1  ;;  %v600_v5 = vsub.f32 1.0, %v2046_v4  ;;  %v602_v8 = vmul.f32 %v2046_v4, %v2370_v39  ;;  %v727_v4 = vld [vmem:[%s726_s9] sm:$0xff] }
 0x134   : > { %2047 = vtanh.f32 %v598_v3 }
 0x141   : > { %v2048_v6 = vpop.eup %2047 }
 0x142   : > { %v601_v7 = vmul.f32 %v2048_v6, %v600_v5 }
 0x144   : > { %v2455_v9 = vadd.f32 %v602_v8, %v601_v7 }
 0x146   : > { %606 = vst [vmem:[%s605_s28] sm:$0xf] %v2455_v9  ;;  %v613_v10 = vpack.c.bf16 %v2455_v9, %v2455_v9  ;;  %s1725_s28 = smul.u32 12, %s2647_s26 }
 0x148   : > { %647 = vmatmul.mubr.bf16.vlgmr.msra.gmra.mxu0 %v613_v10  ;;  %1838 = vmatmul.mubr.bf16.vlgmr.msra.gmra.mxu1 %v613_v10  ;;  %s958_s12 = scalar_lea.vmem %s2438_s18, %s1725_s28 [#allocation3]  ;;  %s1717_s28 = sshll.u32 (%p2237_p6), %s2169_s14, 2 }
 0x149   : > { %731 = vmatpush1.bf16.msra.mxu0 %v2289_v19  ;;  %1842 = vmatpush3.bf16.msra.mxu1 %v2312_v25 }
 0x14a   : > { %732 = vmatprep.subr.bf16.mxu0 %v2293_v20  ;;  %1843 = vmatprep.subr.bf16.mxu1 %v2179_v16 }
 0x14b   : > { %762 = vmatprep.mubr.bf16.mxu0 %v2180_v17  ;;  %1857 = vmatprep.mubr.msk.bf16.mxu1 %vm2181_vm0, %v2179_v16 }
 0x14d   : > { %733 = vmatpush1.bf16.msra.mxu0 %v2297_v21  ;;  %1844 = vmatpush3.bf16.msra.mxu1 %v2324_v28 }
 0x14e   : > { %734 = vmatprep.subr.bf16.mxu0 %v2301_v22  ;;  %1845 = vmatprep.subr.bf16.mxu1 %v2179_v16 }
 0x151   : > { %735 = vmatpush1.bf16.msra.mxu0 %v2305_v23  ;;  %1846 = vmatpush3.bf16.msra.mxu1 %v2337_v31 }
 0x152   : > { %736 = vmatprep.subr.bf16.mxu0 %v2309_v24  ;;  %1847 = vmatprep.subr.bf16.mxu1 %v2179_v16 }
 0x155   : > { %737 = vmatpush1.bf16.msra.mxu0 %v2316_v26  ;;  %1848 = vmatpush3.bf16.msra.mxu1 %v2350_v34 }
 0x156   : > { %738 = vmatprep.subr.bf16.mxu0 %v2320_v27  ;;  %1849 = vmatprep.subr.bf16.mxu1 %v2179_v16 }
 0x159   : > { %739 = vmatpush1.bf16.msra.mxu0 %v2328_v29  ;;  %1850 = vmatpush3.bf16.msra.mxu1 %v2363_v37 }
 0x15a   : > { %740 = vmatprep.subr.bf16.mxu0 %v2332_v30  ;;  %1851 = vmatprep.subr.bf16.mxu1 %v2179_v16 }
 0x15d   : > { %741 = vmatpush1.bf16.msra.mxu0 %v2342_v32  ;;  %1852 = vmatpush3.bf16.msra.mxu1 %v2375_v40 }
 0x15e   : > { %742 = vmatprep.subr.bf16.mxu0 %v2346_v33  ;;  %1853 = vmatprep.subr.bf16.mxu1 %v2179_v16 }
 0x161   : > { %743 = vmatpush1.bf16.msra.mxu0 %v2355_v35  ;;  %1854 = vmatpush3.bf16.msra.mxu1 %v2383_v42 }
 0x162   : > { %744 = vmatprep.subr.bf16.mxu0 %v2359_v36  ;;  %1855 = vmatprep.subr.bf16.mxu1 %v2179_v16 }
 0x165   : > { %745 = vmatpush1.bf16.msra.mxu0 %v2368_v38  ;;  %1856 = vmatpush3.bf16.msra.mxu1 %v2391_v43 }
 0x166   : > { %846 = vmatprep.subr.bf16.mxu0 %v2286_v18  ;;  %1861 = vmatprep.subr.bf16.mxu1 %v2179_v16 }
 0x208   : > { %v648_v12 = vpop.f32.mrf.mxu0  ;;  %v689_v13 = vpop.f32.mrf.mxu1 }
 0x209   : > { %v695_v14 = vadd.f32 %v648_v12, %v611_v11  ;;  %v712_v55 = vadd.f32 %v2445_v61, %v689_v13  ;;  %v819_v11 = vrot.slane %v727_v4, 4 }
 0x20a   : > { %v650_v15 = vpop.f32.mrf.mxu0  ;;  %v1839_v39 = vpop.f32.mrf.mxu1 }
 0x20b   : > { %v1689_v41 = vmul.f32 -1.442695, %v695_v14  ;;  %v705_v49 = vadd.f32 %v703_v44, %v650_v15 }
 0x20c   : > { %v652_v45 = vpop.f32.mrf.mxu0  ;;  %v692_v46 = vpop.f32.mrf.mxu1 }
 0x20d   : > { %2049 = vpow2.f32 %v1689_v41  ;;  %v1690_v50 = vmul.f32 -1.442695, %v705_v49 }
 0x20e   : > { %v653_v47 = vpop.f32.mrf.mxu0  ;;  %v1840_v48 = vpop.f32.mrf.mxu1 }
 0x20f   : > { %2051 = vpow2.f32 %v1690_v50  ;;  %v728_v50 = vld [vmem:[%s726_s9 + $0x8] sm:$0xf]  ;;  %s1185_s9 = scalar_lea.vmem %s2452_s27, %s1707_s8 [#allocation4] }
 0x21a   : > { %v2050_v51 = vpop.eup %2049 }
 0x21b   : > { %v699_v52 = vadd.f32 1.0, %v2050_v51 }
 0x21c   : > { %v2052_v53 = vpop.eup %2051 }
 0x21d   : > { %2053 = vrcp.f32 %v699_v52  ;;  %v709_v54 = vadd.f32 1.0, %v2052_v53 }
 0x21f   : > { %2055 = vrcp.f32 %v709_v54 }
 0x22a   : > { %v2054_v56 = vpop.eup %2053 }
 0x22b   : > { %v713_v58 = vmul.f32 %v2054_v56, %v712_v55 }
 0x22c   : > { %v2056_v60 = vpop.eup %2055 }
 0x22d   : > { %v714_v59 = vadd.f32 %v713_v58, %v612_v57  ;;  %v716_v62 = vsub.f32 1.0, %v2056_v60  ;;  %v718_v1 = vmul.f32 %v2056_v60, %v2455_v9  ;;  %v843_v60 = vld [vmem:[%s842_s23] sm:$0xff] }
 0x22f   : > { %2057 = vtanh.f32 %v714_v59 }
 0x23c   : > { %v2058_v63 = vpop.eup %2057 }
 0x23d   : > { %v717_v0 = vmul.f32 %v2058_v63, %v716_v62 }
 0x23f   : > { %v2505_v2 = vadd.f32 %v718_v1, %v717_v0 }
 0x241   : > { %722 = vst [vmem:[%s721_s5] sm:$0xf] %v2505_v2  ;;  %v729_v3 = vpack.c.bf16 %v2505_v2, %v2505_v2  ;;  %s1726_s5 = smul.u32 12, %s2697_s4 }
 0x243   : > { %763 = vmatmul.mubr.bf16.vlgmr.msra.gmra.mxu0 %v729_v3  ;;  %1858 = vmatmul.mubr.bf16.vlgmr.msra.gmra.mxu1 %v729_v3  ;;  %s1074_s6 = scalar_lea.vmem %s2438_s18, %s1726_s5 [#allocation3] }
 0x244   : > { %847 = vmatpush1.bf16.msra.mxu0 %v2289_v19  ;;  %1862 = vmatpush3.bf16.msra.mxu1 %v2312_v25 }
 0x245   : > { %848 = vmatprep.subr.bf16.mxu0 %v2293_v20  ;;  %1863 = vmatprep.subr.bf16.mxu1 %v2179_v16 }
 0x246   : > { %878 = vmatprep.mubr.bf16.mxu0 %v2180_v17  ;;  %1877 = vmatprep.mubr.msk.bf16.mxu1 %vm2181_vm0, %v2179_v16 }
 0x248   : > { %849 = vmatpush1.bf16.msra.mxu0 %v2297_v21  ;;  %1864 = vmatpush3.bf16.msra.mxu1 %v2324_v28 }
 0x249   : > { %850 = vmatprep.subr.bf16.mxu0 %v2301_v22  ;;  %1865 = vmatprep.subr.bf16.mxu1 %v2179_v16 }
 0x24c   : > { %851 = vmatpush1.bf16.msra.mxu0 %v2305_v23  ;;  %1866 = vmatpush3.bf16.msra.mxu1 %v2337_v31 }
 0x24d   : > { %852 = vmatprep.subr.bf16.mxu0 %v2309_v24  ;;  %1867 = vmatprep.subr.bf16.mxu1 %v2179_v16 }
 0x250   : > { %853 = vmatpush1.bf16.msra.mxu0 %v2316_v26  ;;  %1868 = vmatpush3.bf16.msra.mxu1 %v2350_v34 }
 0x251   : > { %854 = vmatprep.subr.bf16.mxu0 %v2320_v27  ;;  %1869 = vmatprep.subr.bf16.mxu1 %v2179_v16 }
 0x254   : > { %855 = vmatpush1.bf16.msra.mxu0 %v2328_v29  ;;  %1870 = vmatpush3.bf16.msra.mxu1 %v2363_v37 }
 0x255   : > { %856 = vmatprep.subr.bf16.mxu0 %v2332_v30  ;;  %1871 = vmatprep.subr.bf16.mxu1 %v2179_v16 }
 0x258   : > { %857 = vmatpush1.bf16.msra.mxu0 %v2342_v32  ;;  %1872 = vmatpush3.bf16.msra.mxu1 %v2375_v40 }
 0x259   : > { %858 = vmatprep.subr.bf16.mxu0 %v2346_v33  ;;  %1873 = vmatprep.subr.bf16.mxu1 %v2179_v16 }
 0x25c   : > { %859 = vmatpush1.bf16.msra.mxu0 %v2355_v35  ;;  %1874 = vmatpush3.bf16.msra.mxu1 %v2383_v42 }
 0x25d   : > { %860 = vmatprep.subr.bf16.mxu0 %v2359_v36  ;;  %1875 = vmatprep.subr.bf16.mxu1 %v2179_v16 }
 0x260   : > { %861 = vmatpush1.bf16.msra.mxu0 %v2368_v38  ;;  %1876 = vmatpush3.bf16.msra.mxu1 %v2391_v43 }
 0x261   : > { %962 = vmatprep.subr.bf16.mxu0 %v2286_v18  ;;  %1881 = vmatprep.subr.bf16.mxu1 %v2179_v16 }
 0x303   : > { %v764_v5 = vpop.f32.mrf.mxu0  ;;  %v805_v6 = vpop.f32.mrf.mxu1 }
 0x304   : > { %v811_v7 = vadd.f32 %v764_v5, %v727_v4  ;;  %v828_v48 = vadd.f32 %v2445_v61, %v805_v6  ;;  %v935_v4 = vrot.slane %v843_v60, 4 }
 0x305   : > { %v766_v8 = vpop.f32.mrf.mxu0  ;;  %v1859_v9 = vpop.f32.mrf.mxu1 }
 0x306   : > { %v1693_v10 = vmul.f32 -1.442695, %v811_v7  ;;  %v821_v39 = vadd.f32 %v819_v11, %v766_v8 }
 0x307   : > { %v768_v12 = vpop.f32.mrf.mxu0  ;;  %v808_v13 = vpop.f32.mrf.mxu1 }
 0x308   : > { %2059 = vpow2.f32 %v1693_v10  ;;  %v1694_v41 = vmul.f32 -1.442695, %v821_v39 }
 0x309   : > { %v769_v14 = vpop.f32.mrf.mxu0  ;;  %v1860_v15 = vpop.f32.mrf.mxu1 }
 0x30a   : > { %2061 = vpow2.f32 %v1694_v41  ;;  %v844_v41 = vld [vmem:[%s842_s23 + $0x8] sm:$0xf]  ;;  %s2755_s23 = scalar_select %p361_p12, 0, 7 }
 0x30c   : > { %s1728_s24 = smul.u32 12, %s2755_s23 }
 0x315   : > { %v2060_v44 = vpop.eup %2059 }
 0x316   : > { %v815_v45 = vadd.f32 1.0, %v2060_v44 }
 0x317   : > { %v2062_v46 = vpop.eup %2061 }
 0x318   : > { %2063 = vrcp.f32 %v815_v45  ;;  %v825_v47 = vadd.f32 1.0, %v2062_v46 }
 0x31a   : > { %2065 = vrcp.f32 %v825_v47 }
 0x325   : > { %v2064_v49 = vpop.eup %2063 }
 0x326   : > { %v829_v51 = vmul.f32 %v2064_v49, %v828_v48 }
 0x327   : > { %v2066_v53 = vpop.eup %2065 }
 0x328   : > { %v830_v52 = vadd.f32 %v829_v51, %v728_v50  ;;  %v832_v54 = vsub.f32 1.0, %v2066_v53  ;;  %v834_v57 = vmul.f32 %v2066_v53, %v2505_v2  ;;  %v959_v53 = vld [vmem:[%s958_s12] sm:$0xff] }
 0x32a   : > { %2067 = vtanh.f32 %v830_v52 }
 0x337   : > { %v2068_v55 = vpop.eup %2067 }
 0x338   : > { %v833_v56 = vmul.f32 %v2068_v55, %v832_v54 }
 0x33a   : > { %v2555_v58 = vadd.f32 %v834_v57, %v833_v56 }
 0x33c   : > { %838 = vst [vmem:[%s837_s11] sm:$0xf] %v2555_v58  ;;  %v845_v59 = vpack.c.bf16 %v2555_v58, %v2555_v58  ;;  %s1727_s11 = smul.u32 12, %s2745_s10 }
 0x33e   : > { %879 = vmatmul.mubr.bf16.vlgmr.msra.gmra.mxu0 %v845_v59  ;;  %1878 = vmatmul.mubr.bf16.vlgmr.msra.gmra.mxu1 %v845_v59  ;;  %s1190_s19 = scalar_lea.vmem %s2438_s18, %s1727_s11 [#allocation3] }
 0x33f   : > { %963 = vmatpush1.bf16.msra.mxu0 %v2289_v19  ;;  %1882 = vmatpush3.bf16.msra.mxu1 %v2312_v25 }
 0x340   : > { %964 = vmatprep.subr.bf16.mxu0 %v2293_v20  ;;  %1883 = vmatprep.subr.bf16.mxu1 %v2179_v16 }
 0x341   : > { %994 = vmatprep.mubr.bf16.mxu0 %v2180_v17  ;;  %1897 = vmatprep.mubr.msk.bf16.mxu1 %vm2181_vm0, %v2179_v16 }
 0x343   : > { %965 = vmatpush1.bf16.msra.mxu0 %v2297_v21  ;;  %1884 = vmatpush3.bf16.msra.mxu1 %v2324_v28 }
 0x344   : > { %966 = vmatprep.subr.bf16.mxu0 %v2301_v22  ;;  %1885 = vmatprep.subr.bf16.mxu1 %v2179_v16 }
 0x347   : > { %967 = vmatpush1.bf16.msra.mxu0 %v2305_v23  ;;  %1886 = vmatpush3.bf16.msra.mxu1 %v2337_v31 }
 0x348   : > { %968 = vmatprep.subr.bf16.mxu0 %v2309_v24  ;;  %1887 = vmatprep.subr.bf16.mxu1 %v2179_v16 }
 0x34b   : > { %969 = vmatpush1.bf16.msra.mxu0 %v2316_v26  ;;  %1888 = vmatpush3.bf16.msra.mxu1 %v2350_v34 }
 0x34c   : > { %970 = vmatprep.subr.bf16.mxu0 %v2320_v27  ;;  %1889 = vmatprep.subr.bf16.mxu1 %v2179_v16 }
 0x34f   : > { %971 = vmatpush1.bf16.msra.mxu0 %v2328_v29  ;;  %1890 = vmatpush3.bf16.msra.mxu1 %v2363_v37 }
 0x350   : > { %972 = vmatprep.subr.bf16.mxu0 %v2332_v30  ;;  %1891 = vmatprep.subr.bf16.mxu1 %v2179_v16 }
 0x353   : > { %973 = vmatpush1.bf16.msra.mxu0 %v2342_v32  ;;  %1892 = vmatpush3.bf16.msra.mxu1 %v2375_v40 }
 0x354   : > { %974 = vmatprep.subr.bf16.mxu0 %v2346_v33  ;;  %1893 = vmatprep.subr.bf16.mxu1 %v2179_v16 }
 0x357   : > { %975 = vmatpush1.bf16.msra.mxu0 %v2355_v35  ;;  %1894 = vmatpush3.bf16.msra.mxu1 %v2383_v42 }
 0x358   : > { %976 = vmatprep.subr.bf16.mxu0 %v2359_v36  ;;  %1895 = vmatprep.subr.bf16.mxu1 %v2179_v16 }
 0x35b   : > { %977 = vmatpush1.bf16.msra.mxu0 %v2368_v38  ;;  %1896 = vmatpush3.bf16.msra.mxu1 %v2391_v43 }
 0x35c   : > { %1078 = vmatprep.subr.bf16.mxu0 %v2286_v18  ;;  %1901 = vmatprep.subr.bf16.mxu1 %v2179_v16 }
 0x3fe   : > { %v880_v62 = vpop.f32.mrf.mxu0  ;;  %v921_v63 = vpop.f32.mrf.mxu1 }
 0x3ff   : > { %v927_v0 = vadd.f32 %v880_v62, %v843_v60  ;;  %v944_v15 = vadd.f32 %v2445_v61, %v921_v63  ;;  %v1051_v60 = vrot.slane %v959_v53, 4 }
 0x400   : > { %v882_v1 = vpop.f32.mrf.mxu0  ;;  %v1879_v2 = vpop.f32.mrf.mxu1 }
 0x401   : > { %v1697_v3 = vmul.f32 -1.442695, %v927_v0  ;;  %v937_v9 = vadd.f32 %v935_v4, %v882_v1 }
 0x402   : > { %v884_v5 = vpop.f32.mrf.mxu0  ;;  %v924_v6 = vpop.f32.mrf.mxu1 }
 0x403   : > { %2069 = vpow2.f32 %v1697_v3  ;;  %v1698_v10 = vmul.f32 -1.442695, %v937_v9  ;;  %v960_v9 = vld [vmem:[%s958_s12 + $0x8] sm:$0xf] }
 0x404   : > { %v885_v7 = vpop.f32.mrf.mxu0  ;;  %v1880_v8 = vpop.f32.mrf.mxu1 }
 0x405   : > { %2071 = vpow2.f32 %v1698_v10 }
 0x410   : > { %v2070_v11 = vpop.eup %2069 }
 0x411   : > { %v931_v12 = vadd.f32 1.0, %v2070_v11 }
 0x412   : > { %v2072_v13 = vpop.eup %2071 }
 0x413   : > { %2073 = vrcp.f32 %v931_v12  ;;  %v941_v14 = vadd.f32 1.0, %v2072_v13 }
 0x415   : > { %2075 = vrcp.f32 %v941_v14 }
 0x420   : > { %v2074_v39 = vpop.eup %2073 }
 0x421   : > { %v945_v44 = vmul.f32 %v2074_v39, %v944_v15 }
 0x422   : > { %v2076_v46 = vpop.eup %2075 }
 0x423   : > { %v946_v45 = vadd.f32 %v945_v44, %v844_v41  ;;  %v948_v47 = vsub.f32 1.0, %v2076_v46  ;;  %v950_v50 = vmul.f32 %v2076_v46, %v2555_v58 }
 0x425   : > { %2077 = vtanh.f32 %v946_v45 }
 0x432   : > { %v2078_v48 = vpop.eup %2077 }
 0x433   : > { %v949_v49 = vmul.f32 %v2078_v48, %v948_v47  ;;  %v1076_v47 = vld [vmem:[%s1074_s6 + $0x8] sm:$0xf] }
 0x435   : > { %v2605_v51 = vadd.f32 %v950_v50, %v949_v49 }
 0x437   : > { %954 = vst [vmem:[%s953_s25] sm:$0xf] %v2605_v51  ;;  %v961_v52 = vpack.c.bf16 %v2605_v51, %v2605_v51  ;;  %s1306_s25 = scalar_lea.vmem %s2438_s18, %s1728_s24 [#allocation3]  ;;  %s1715_s18 = sshll.u32 %s2755_s23, 2 }
 0x438   : > { %s1417_s26 = scalar_lea.vmem %s2452_s27, %s1715_s18 [#allocation4] }
 0x439   : > { %995 = vmatmul.mubr.bf16.vlgmr.msra.gmra.mxu0 %v961_v52  ;;  %1898 = vmatmul.mubr.bf16.vlgmr.msra.gmra.mxu1 %v961_v52 }
 0x43a   : > { %1079 = vmatpush1.bf16.msra.mxu0 %v2289_v19  ;;  %1902 = vmatpush3.bf16.msra.mxu1 %v2312_v25 }
 0x43b   : > { %1080 = vmatprep.subr.bf16.mxu0 %v2293_v20  ;;  %1903 = vmatprep.subr.bf16.mxu1 %v2179_v16 }
 0x43c   : > { %1110 = vmatprep.mubr.bf16.mxu0 %v2180_v17  ;;  %1917 = vmatprep.mubr.msk.bf16.mxu1 %vm2181_vm0, %v2179_v16 }
 0x43e   : > { %1081 = vmatpush1.bf16.msra.mxu0 %v2297_v21  ;;  %1904 = vmatpush3.bf16.msra.mxu1 %v2324_v28 }
 0x43f   : > { %1082 = vmatprep.subr.bf16.mxu0 %v2301_v22  ;;  %1905 = vmatprep.subr.bf16.mxu1 %v2179_v16 }
 0x442   : > { %1083 = vmatpush1.bf16.msra.mxu0 %v2305_v23  ;;  %1906 = vmatpush3.bf16.msra.mxu1 %v2337_v31 }
 0x443   : > { %1084 = vmatprep.subr.bf16.mxu0 %v2309_v24  ;;  %1907 = vmatprep.subr.bf16.mxu1 %v2179_v16 }
 0x446   : > { %1085 = vmatpush1.bf16.msra.mxu0 %v2316_v26  ;;  %1908 = vmatpush3.bf16.msra.mxu1 %v2350_v34 }
 0x447   : > { %1086 = vmatprep.subr.bf16.mxu0 %v2320_v27  ;;  %1909 = vmatprep.subr.bf16.mxu1 %v2179_v16 }
 0x44a   : > { %1087 = vmatpush1.bf16.msra.mxu0 %v2328_v29  ;;  %1910 = vmatpush3.bf16.msra.mxu1 %v2363_v37 }
 0x44b   : > { %1088 = vmatprep.subr.bf16.mxu0 %v2332_v30  ;;  %1911 = vmatprep.subr.bf16.mxu1 %v2179_v16 }
 0x44e   : > { %1089 = vmatpush1.bf16.msra.mxu0 %v2342_v32  ;;  %1912 = vmatpush3.bf16.msra.mxu1 %v2375_v40 }
 0x44f   : > { %1090 = vmatprep.subr.bf16.mxu0 %v2346_v33  ;;  %1913 = vmatprep.subr.bf16.mxu1 %v2179_v16 }
 0x452   : > { %1091 = vmatpush1.bf16.msra.mxu0 %v2355_v35  ;;  %1914 = vmatpush3.bf16.msra.mxu1 %v2383_v42 }
 0x453   : > { %1092 = vmatprep.subr.bf16.mxu0 %v2359_v36  ;;  %1915 = vmatprep.subr.bf16.mxu1 %v2179_v16 }
 0x456   : > { %1093 = vmatpush1.bf16.msra.mxu0 %v2368_v38  ;;  %1916 = vmatpush3.bf16.msra.mxu1 %v2391_v43 }
 0x457   : > { %1194 = vmatprep.subr.bf16.mxu0 %v2286_v18  ;;  %1921 = vmatprep.subr.bf16.mxu1 %v2179_v16 }
 0x4f9   : > { %v996_v54 = vpop.f32.mrf.mxu0  ;;  %v1037_v55 = vpop.f32.mrf.mxu1 }
 0x4fa   : > { %v1043_v56 = vadd.f32 %v996_v54, %v959_v53  ;;  %v1060_v7 = vadd.f32 %v2445_v61, %v1037_v55 }
 0x4fb   : > { %v998_v57 = vpop.f32.mrf.mxu0  ;;  %v1899_v58 = vpop.f32.mrf.mxu1 }
 0x4fc   : > { %v1701_v59 = vmul.f32 -1.442695, %v1043_v56  ;;  %v1053_v1 = vadd.f32 %v1051_v60, %v998_v57  ;;  %v2120_v57 = vld [vmem:[%s2283_s7 + $0xa8] ss:$12 sps:$4 sm:$0xff]   ;;  %v2121_v58 = vld [vmem:[%s2283_s7 + $0xb0] ss:$12 sps:$4 sm:$0xff]  }
 0x4fd   : > { %v1000_v62 = vpop.f32.mrf.mxu0  ;;  %v1040_v63 = vpop.f32.mrf.mxu1  ;;  %v2123_v60 = vld [vmem:[%s2283_s7 + $0x90] ss:$12 sps:$4 sm:$0xff]  }
 0x4fe   : > { %2079 = vpow2.f32 %v1701_v59  ;;  %v1702_v2 = vmul.f32 -1.442695, %v1053_v1  ;;  %v2122_v59 = vld [vmem:[%s2283_s7 + $0x94] ss:$12 sps:$4 sm:$0xff]   ;;  %v2124_v62 = vld [vmem:[%s2283_s7 + $0x98] ss:$12 sps:$4 sm:$0xff]  }
 0x4ff   : > { %v1001_v18 = vpop.f32.mrf.mxu0  ;;  %v1900_v0 = vpop.f32.mrf.mxu1  ;;  %v2125_v63 = vld [vmem:[%s2283_s7 + $0x7c] ss:$12 sps:$4 sm:$0xff]   ;;  %v2129_v1 = vld [vmem:[%s2283_s7 + $0x60] ss:$12 sps:$4 sm:$0xff]  }
 0x500   : > { %2081 = vpow2.f32 %v1702_v2  ;;  %v2126_v18 = vld [vmem:[%s2283_s7 + $0x78] ss:$12 sps:$4 sm:$0xff]   ;;  %v2127_v0 = vld [vmem:[%s2283_s7 + $0x80] ss:$12 sps:$4 sm:$0xff]   ;;  %v2130_v2 = vld [vmem:[%s2283_s7 + $0x68] ss:$12 sps:$4 sm:$0xff]  }
 0x50b   : > { %v2080_v3 = vpop.eup %2079 }
 0x50c   : > { %v1047_v4 = vadd.f32 1.0, %v2080_v3  ;;  %v2131_v3 = vld [vmem:[%s2283_s7 + $0x4c] ss:$12 sps:$4 sm:$0xff]  }
 0x50d   : > { %v2082_v5 = vpop.eup %2081 }
 0x50e   : > { %2083 = vrcp.f32 %v1047_v4  ;;  %v1057_v6 = vadd.f32 1.0, %v2082_v5  ;;  %v2132_v4 = vld [vmem:[%s2283_s7 + $0x48] ss:$12 sps:$4 sm:$0xff]  }
 0x50f   : > { %v2133_v5 = vld [vmem:[%s2283_s7 + $0x34] ss:$12 sps:$4 sm:$0xff]  }
 0x510   : > { %2085 = vrcp.f32 %v1057_v6  ;;  %v2134_v6 = vld [vmem:[%s2283_s7 + $0x30] ss:$12 sps:$4 sm:$0xff]  }
 0x51b   : > { %v2084_v8 = vpop.eup %2083 }
 0x51c   : > { %v1061_v10 = vmul.f32 %v2084_v8, %v1060_v7  ;;  %v2135_v7 = vld [vmem:[%s2283_s7 + $0x1c] ss:$12 sps:$4 sm:$0xff]   ;;  %v2136_v8 = vld [vmem:[%s2283_s7 + $0x18] ss:$12 sps:$4 sm:$0xff]  }
 0x51d   : > { %v2086_v12 = vpop.eup %2085 }
 0x51e   : > { %v1062_v11 = vadd.f32 %v1061_v10, %v960_v9  ;;  %v1064_v13 = vsub.f32 1.0, %v2086_v12  ;;  %v1066_v39 = vmul.f32 %v2086_v12, %v2605_v51  ;;  %v2138_v9 = vld [vmem:[%s2283_s7] ss:$12 sps:$4 sm:$0xff]  }
 0x520   : > { %2087 = vtanh.f32 %v1062_v11 }
 0x52d   : > { %v2088_v14 = vpop.eup %2087 }
 0x52e   : > { %v1065_v15 = vmul.f32 %v2088_v14, %v1064_v13 }
 0x530   : > { %v2655_v41 = vadd.f32 %v1066_v39, %v1065_v15 }
 0x532   : > { %1070 = vst [vmem:[%s1069_s30] sm:$0xf] %v2655_v41  ;;  %v1077_v44 = vpack.c.bf16 %v2655_v41, %v2655_v41  ;;  %s1436_s30 = scalar_lea.vmem (%p2237_p6), %s2794_s3, %s1717_s28 }
 0x534   : > { %1111 = vmatmul.mubr.bf16.vlgmr.msra.gmra.mxu0 %v1077_v44  ;;  %1918 = vmatmul.mubr.bf16.vlgmr.msra.gmra.mxu1 %v1077_v44 }
 0x535   : > { %1195 = vmatpush1.bf16.msra.mxu0 %v2289_v19  ;;  %1922 = vmatpush3.bf16.msra.mxu1 %v2312_v25  ;;  %v2119_v19 = vld [vmem:[%s2283_s7 + $0xac] ss:$12 sps:$4 sm:$0xff]  }
 0x536   : > { %1196 = vmatprep.subr.bf16.mxu0 %v2293_v20  ;;  %1923 = vmatprep.subr.bf16.mxu1 %v2179_v16  ;;  %v1075_v20 = vld [vmem:[%s1074_s6] sm:$0xff] }
 0x537   : > { %1226 = vmatprep.mubr.bf16.mxu0 %v2180_v17  ;;  %1937 = vmatprep.mubr.msk.bf16.mxu1 %vm2181_vm0, %v2179_v16 }
 0x539   : > { %1197 = vmatpush1.bf16.msra.mxu0 %v2297_v21  ;;  %1924 = vmatpush3.bf16.msra.mxu1 %v2324_v28 }
 0x53a   : > { %1198 = vmatprep.subr.bf16.mxu0 %v2301_v22  ;;  %1925 = vmatprep.subr.bf16.mxu1 %v2179_v16 }
 0x53d   : > { %1199 = vmatpush1.bf16.msra.mxu0 %v2305_v23  ;;  %1926 = vmatpush3.bf16.msra.mxu1 %v2337_v31 }
 0x53e   : > { %1200 = vmatprep.subr.bf16.mxu0 %v2309_v24  ;;  %1927 = vmatprep.subr.bf16.mxu1 %v2179_v16 }
 0x541   : > { %1201 = vmatpush1.bf16.msra.mxu0 %v2316_v26  ;;  %1928 = vmatpush3.bf16.msra.mxu1 %v2350_v34 }
 0x542   : > { %1202 = vmatprep.subr.bf16.mxu0 %v2320_v27  ;;  %1929 = vmatprep.subr.bf16.mxu1 %v2179_v16  ;;  %v1167_v27 = vrot.slane %v1075_v20, 4 }
 0x545   : > { %1203 = vmatpush1.bf16.msra.mxu0 %v2328_v29  ;;  %1930 = vmatpush3.bf16.msra.mxu1 %v2363_v37 }
 0x546   : > { %1204 = vmatprep.subr.bf16.mxu0 %v2332_v30  ;;  %1931 = vmatprep.subr.bf16.mxu1 %v2179_v16 }
 0x549   : > { %1205 = vmatpush1.bf16.msra.mxu0 %v2342_v32  ;;  %1932 = vmatpush3.bf16.msra.mxu1 %v2375_v40 }
 0x54a   : > { %1206 = vmatprep.subr.bf16.mxu0 %v2346_v33  ;;  %1933 = vmatprep.subr.bf16.mxu1 %v2179_v16 }
 0x54d   : > { %1207 = vmatpush1.bf16.msra.mxu0 %v2355_v35  ;;  %1934 = vmatpush3.bf16.msra.mxu1 %v2383_v42 }
 0x54e   : > { %1208 = vmatprep.subr.bf16.mxu0 %v2359_v36  ;;  %1935 = vmatprep.subr.bf16.mxu1 %v2179_v16 }
 0x551   : > { %1209 = vmatpush1.bf16.msra.mxu0 %v2368_v38  ;;  %1936 = vmatpush3.bf16.msra.mxu1 %v2391_v43 }
 0x552   : > { %1310 = vmatprep.subr.bf16.mxu0 %v2119_v19  ;;  %1941 = vmatprep.subr.bf16.mxu1 %v2179_v16 }
 0x5f4   : > { %v1112_v21 = vpop.f32.mrf.mxu0  ;;  %v1153_v22 = vpop.f32.mrf.mxu1 }
 0x5f5   : > { %v1159_v23 = vadd.f32 %v1112_v21, %v1075_v20  ;;  %v1176_v45 = vadd.f32 %v2445_v61, %v1153_v22 }
 0x5f6   : > { %v1114_v24 = vpop.f32.mrf.mxu0  ;;  %v1919_v25 = vpop.f32.mrf.mxu1 }
 0x5f7   : > { %v1705_v26 = vmul.f32 -1.442695, %v1159_v23  ;;  %v1169_v32 = vadd.f32 %v1167_v27, %v1114_v24 }
 0x5f8   : > { %v1116_v28 = vpop.f32.mrf.mxu0  ;;  %v1156_v29 = vpop.f32.mrf.mxu1 }
 0x5f9   : > { %2089 = vpow2.f32 %v1705_v26  ;;  %v1706_v33 = vmul.f32 -1.442695, %v1169_v32  ;;  %v1192_v26 = vld [vmem:[%s1190_s19 + $0x8] sm:$0xf] }
 0x5fa   : > { %v1117_v30 = vpop.f32.mrf.mxu0  ;;  %v1920_v31 = vpop.f32.mrf.mxu1 }
 0x5fb   : > { %2091 = vpow2.f32 %v1706_v33 }
 0x606   : > { %v2090_v34 = vpop.eup %2089 }
 0x607   : > { %v1163_v35 = vadd.f32 1.0, %v2090_v34 }
 0x608   : > { %v2092_v36 = vpop.eup %2091 }
 0x609   : > { %2093 = vrcp.f32 %v1163_v35  ;;  %v1173_v38 = vadd.f32 1.0, %v2092_v36  ;;  %v1307_v36 = vld [vmem:[%s1306_s25] sm:$0xff] }
 0x60b   : > { %2095 = vrcp.f32 %v1173_v38 }
 0x616   : > { %v2094_v46 = vpop.eup %2093 }
 0x617   : > { %v1177_v48 = vmul.f32 %v2094_v46, %v1176_v45 }
 0x618   : > { %v2096_v50 = vpop.eup %2095 }
 0x619   : > { %v1178_v49 = vadd.f32 %v1177_v48, %v1076_v47  ;;  %v1180_v51 = vsub.f32 1.0, %v2096_v50  ;;  %v1182_v54 = vmul.f32 %v2096_v50, %v2655_v41  ;;  %v1399_v50 = vrot.slane %v1307_v36, 4 }
 0x61b   : > { %2097 = vtanh.f32 %v1178_v49 }
 0x628   : > { %v2098_v52 = vpop.eup %2097 }
 0x629   : > { %v1181_v53 = vmul.f32 %v2098_v52, %v1180_v51 }
 0x62b   : > { %v2705_v55 = vadd.f32 %v1182_v54, %v1181_v53 }
 0x62d   : > { %1186 = vst [vmem:[%s1185_s9] sm:$0xf] %v2705_v55  ;;  %v1193_v56 = vpack.c.bf16 %v2705_v55, %v2705_v55 }
 0x62f   : > { %1227 = vmatmul.mubr.bf16.vlgmr.msra.gmra.mxu0 %v1193_v56  ;;  %1938 = vmatmul.mubr.bf16.vlgmr.msra.gmra.mxu1 %v1193_v56 }
 0x630   : > { %1311 = vmatpush1.bf16.msra.mxu0 %v2120_v57  ;;  %1942 = vmatpush3.bf16.msra.mxu1 %v2121_v58 }
 0x631   : > { %1312 = vmatprep.subr.bf16.mxu0 %v2122_v59  ;;  %1943 = vmatprep.subr.bf16.mxu1 %v2179_v16 }
 0x632   : > { %1342 = vmatprep.mubr.bf16.mxu0 %v2180_v17  ;;  %1957 = vmatprep.mubr.msk.bf16.mxu1 %vm2181_vm0, %v2179_v16  ;;  %v2128_v17 = vld [vmem:[%s2283_s7 + $0x64] ss:$12 sps:$4 sm:$0xff]  }
 0x634   : > { %1313 = vmatpush1.bf16.msra.mxu0 %v2123_v60  ;;  %1944 = vmatpush3.bf16.msra.mxu1 %v2124_v62 }
 0x635   : > { %1314 = vmatprep.subr.bf16.mxu0 %v2125_v63  ;;  %1945 = vmatprep.subr.bf16.mxu1 %v2179_v16 }
 0x638   : > { %1315 = vmatpush1.bf16.msra.mxu0 %v2126_v18  ;;  %1946 = vmatpush3.bf16.msra.mxu1 %v2127_v0  ;;  %v1308_v18 = vld [vmem:[%s1306_s25 + $0x8] sm:$0xf] }
 0x639   : > { %1316 = vmatprep.subr.bf16.mxu0 %v2128_v17  ;;  %1947 = vmatprep.subr.bf16.mxu1 %v2179_v16 }
 0x63c   : > { %1317 = vmatpush1.bf16.msra.mxu0 %v2129_v1  ;;  %1948 = vmatpush3.bf16.msra.mxu1 %v2130_v2 }
 0x63d   : > { %1318 = vmatprep.subr.bf16.mxu0 %v2131_v3  ;;  %1949 = vmatprep.subr.bf16.mxu1 %v2179_v16 }
 0x640   : > { %1319 = vmatpush1.bf16.msra.mxu0 %v2132_v4  ;;  %1950 = vmatpush3.bf16.msra.mxu1 %v2363_v37  ;;  %v2137_v37 = vld [vmem:[%s2283_s7 + $0x4] ss:$12 sps:$4 sm:$0xff]   ;;  %s1711_s7 = sshll.u32 %s2745_s10, 2 }
 0x641   : > { %1320 = vmatprep.subr.bf16.mxu0 %v2133_v5  ;;  %1951 = vmatprep.subr.bf16.mxu1 %v2179_v16  ;;  %s1301_s20 = scalar_lea.vmem %s2452_s27, %s1711_s7 [#allocation4] }
 0x644   : > { %1321 = vmatpush1.bf16.msra.mxu0 %v2134_v6  ;;  %1952 = vmatpush3.bf16.msra.mxu1 %v2375_v40  ;;  %v1191_v40 = vld [vmem:[%s1190_s19] sm:$0xff] }
 0x645   : > { %1322 = vmatprep.subr.bf16.mxu0 %v2135_v7  ;;  %1953 = vmatprep.subr.bf16.mxu1 %v2179_v16  ;;  %v1283_v15 = vrot.slane %v1191_v40, 4 }
 0x648   : > { %1323 = vmatpush1.bf16.msra.mxu0 %v2136_v8  ;;  %1954 = vmatpush3.bf16.msra.mxu1 %v2383_v42 }
 0x649   : > { %1324 = vmatprep.subr.bf16.mxu0 %v2137_v37  ;;  %1955 = vmatprep.subr.bf16.mxu1 %v2179_v16 }
 0x64c   : > { %1325 = vmatpush1.bf16.msra.mxu0 %v2138_v9  ;;  %1956 = vmatpush3.bf16.msra.mxu1 %v2391_v43 }
 0x6ef   : > { %v1228_v10 = vpop.f32.mrf.mxu0  ;;  %v1269_v11 = vpop.f32.mrf.mxu1 }
 0x6f0   : > { %v1275_v12 = vadd.f32 %v1228_v10, %v1191_v40  ;;  %v1292_v24 = vadd.f32 %v2445_v61, %v1269_v11 }
 0x6f1   : > { %v1230_v13 = vpop.f32.mrf.mxu0  ;;  %v1939_v42 = vpop.f32.mrf.mxu1 }
 0x6f2   : > { %v1709_v14 = vmul.f32 -1.442695, %v1275_v12  ;;  %v1285_v43 = vadd.f32 %v1283_v15, %v1230_v13 }
 0x6f3   : > { %v1232_v39 = vpop.f32.mrf.mxu0  ;;  %v1272_v16 = vpop.f32.mrf.mxu1 }
 0x6f4   : > { %2099 = vpow2.f32 %v1709_v14  ;;  %v1710_v19 = vmul.f32 -1.442695, %v1285_v43 }
 0x6f5   : > { %v1233_v41 = vpop.f32.mrf.mxu0  ;;  %v1940_v44 = vpop.f32.mrf.mxu1 }
 0x6f6   : > { %2101 = vpow2.f32 %v1710_v19 }
 0x701   : > { %v2100_v20 = vpop.eup %2099 }
 0x702   : > { %v1279_v21 = vadd.f32 1.0, %v2100_v20 }
 0x703   : > { %v2102_v22 = vpop.eup %2101 }
 0x704   : > { %2103 = vrcp.f32 %v1279_v21  ;;  %v1289_v23 = vadd.f32 1.0, %v2102_v22 }
 0x706   : > { %2105 = vrcp.f32 %v1289_v23 }
 0x711   : > { %v2104_v25 = vpop.eup %2103 }
 0x712   : > { %v1293_v27 = vmul.f32 %v2104_v25, %v1292_v24 }
 0x713   : > { %v2106_v29 = vpop.eup %2105 }
 0x714   : > { %v1294_v28 = vadd.f32 %v1293_v27, %v1192_v26  ;;  %v1296_v30 = vsub.f32 1.0, %v2106_v29  ;;  %v1298_v33 = vmul.f32 %v2106_v29, %v2705_v55 }
 0x716   : > { %2107 = vtanh.f32 %v1294_v28 }
 0x723   : > { %v2108_v31 = vpop.eup %2107 }
 0x724   : > { %v1297_v32 = vmul.f32 %v2108_v31, %v1296_v30 }
 0x726   : > { %v1299_v34 = vadd.f32 %v1298_v33, %v1297_v32 }
 0x728   : > { %1302 = vst [vmem:[%s1301_s20] sm:$0xf] %v1299_v34  ;;  %v1309_v35 = vpack.c.bf16 %v1299_v34, %v1299_v34 }
 0x72a   : > { %1343 = vmatmul.mubr.bf16.vlgmr.msra.gmra.mxu0 %v1309_v35  ;;  %1958 = vmatmul.mubr.bf16.vlgmr.msra.gmra.mxu1 %v1309_v35 }
 0x7ea   : > { %v1344_v38 = vpop.f32.mrf.mxu0  ;;  %v1385_v45 = vpop.f32.mrf.mxu1 }
 0x7eb   : > { %v1391_v46 = vadd.f32 %v1344_v38, %v1307_v36  ;;  %v1408_v62 = vadd.f32 %v2445_v61, %v1385_v45 }
 0x7ec   : > { %v1346_v47 = vpop.f32.mrf.mxu0  ;;  %v1959_v48 = vpop.f32.mrf.mxu1 }
 0x7ed   : > { %v1713_v49 = vmul.f32 -1.442695, %v1391_v46  ;;  %v1401_v55 = vadd.f32 %v1399_v50, %v1346_v47 }
 0x7ee   : > { %v1348_v51 = vpop.f32.mrf.mxu0  ;;  %v1388_v52 = vpop.f32.mrf.mxu1 }
 0x7ef   : > { %2109 = vpow2.f32 %v1713_v49  ;;  %v1714_v56 = vmul.f32 -1.442695, %v1401_v55 }
 0x7f0   : > { %v1349_v53 = vpop.f32.mrf.mxu0  ;;  %v1960_v54 = vpop.f32.mrf.mxu1 }
 0x7f1   : > { %2111 = vpow2.f32 %v1714_v56 }
 0x7fc   : > { %v2110_v57 = vpop.eup %2109 }
 0x7fd   : > { %v1395_v58 = vadd.f32 1.0, %v2110_v57 }
 0x7fe   : > { %v2112_v59 = vpop.eup %2111 }
 0x7ff   : > { %2113 = vrcp.f32 %v1395_v58  ;;  %v1405_v60 = vadd.f32 1.0, %v2112_v59 }
 0x801   : > { %2115 = vrcp.f32 %v1405_v60 }
 0x80c   : > { %v2114_v63 = vpop.eup %2113 }
 0x80d   : > { %v1409_v0 = vmul.f32 %v2114_v63, %v1408_v62 }
 0x80e   : > { %v2116_v1 = vpop.eup %2115 }
 0x80f   : > { %v1410_v17 = vadd.f32 %v1409_v0, %v1308_v18  ;;  %v1412_v2 = vsub.f32 1.0, %v2116_v1  ;;  %v1414_v5 = vmul.f32 %v2116_v1, %v1299_v34 }
 0x811   : > { %2117 = vtanh.f32 %v1410_v17 }
 0x81e   : > { %v2118_v3 = vpop.eup %2117 }
 0x81f   : > { %v1413_v4 = vmul.f32 %v2118_v3, %v1412_v2  ;;  %1426 = sbr.rel (!%p2237_p6) target bundleno = 2096 (0x830), region = 66 }
 0x821   : > { %v1415_v6 = vadd.f32 %v1414_v5, %v1413_v4 }
 0x823   : > { %1418 = vst [vmem:[%s1417_s26] sm:$0xf] %v1415_v6  ;;  %1419 = vst [vmem:[#allocation2] sm:$0xf] %v1415_v6 }
 0x82a   : > { %v1453_v61 = vld [vmem:[%s2452_s27] sm:$0xf]  ;;  %v1455_v7 = vld [vmem:[%s2452_s27 + $0x4] sm:$0xf]  ;;  %v1457_v8 = vld [vmem:[%s2452_s27 + $0x8] sm:$0xf] }
 0x82b   : > { %v1459_v37 = vld [vmem:[%s2452_s27 + $0xc] sm:$0xf]  ;;  %v1461_v9 = vld [vmem:[%s2452_s27 + $0x10] sm:$0xf]  ;;  %1454 = vst [vmem:[%s1436_s30] sm:$0xf] %v1453_v61 }
 0x82c   : > { %1456 = vst [vmem:[%s1436_s30 + $0x8] sm:$0xf] %v1455_v7  ;;  %1458 = vst [vmem:[%s1436_s30 + $0x10] sm:$0xf] %v1457_v8  ;;  %v1463_v40 = vld [vmem:[%s2452_s27 + $0x14] sm:$0xf] }
 0x82d   : > { %1460 = vst [vmem:[%s1436_s30 + $0x18] sm:$0xf] %v1459_v37  ;;  %1462 = vst [vmem:[%s1436_s30 + $0x20] sm:$0xf] %v1461_v9  ;;  %v1465_v10 = vld [vmem:[%s2452_s27 + $0x18] sm:$0xf] }
 0x82e   : > { %v1467_v11 = vld [vmem:[%s2452_s27 + $0x1c] sm:$0xf]  ;;  %1464 = vst [vmem:[%s1436_s30 + $0x28] sm:$0xf] %v1463_v40  ;;  %1466 = vst [vmem:[%s1436_s30 + $0x30] sm:$0xf] %v1465_v10 }
 0x82f   : > { %1468 = vst [vmem:[%s1436_s30 + $0x38] sm:$0xf] %v1467_v11 }
 0x830 PF: > { %s13_s16 = sadd.s32 1, %s2177_s16   ;;  %s2796_s12 = smov %s2165_s13 }
 0x831   : > { %p10_p13 = scmp.ge.s32.totalorder %s13_s16, 4   ;;  %s2797_s13 = smov %s2242_s22 }
 0x832   : > { %s2798_s14 = smov %s2173_s15  ;;  %s2799_s15 = smov %s2801_s17 }
 0x833   :  { %12 = sbr.rel (!%p10_p13) target bundleno = 3 (0x3), region = 166 }

</bundles_post_ra>
